<compile_context>
chip_gen: v6e
topology: v6e:2x2x1
jax: 0.10.0
libtpu: 0.0.40
codegen_flags: <defaults>
</compile_context>

<pallas_src>
import jax
import jax.numpy as jnp
import numpy as np
from jax.experimental import pallas as pl
from jax.experimental.pallas import tpu as pltpu


# ----------------------------- Pallas kernel ------------------------------- #

def _matmul_bias_kernel(a_ref, w_ref, b_ref, o_ref):
    # a_ref: (TM, K)  im2col patch rows        (row tile of the grid)
    # w_ref: (K, Cout) full weight matrix      (grid-invariant, VMEM resident)
    # b_ref: (1, Cout) bias                    (grid-invariant)
    # o_ref: (TM, Cout)
    acc = jnp.dot(a_ref[...], w_ref[...], preferred_element_type=jnp.float32)
    o_ref[...] = (acc + b_ref[...].astype(jnp.float32)).astype(o_ref.dtype)


def matmul_bias(a, w, b, *, tm=256):
    """out = a @ w + b, tiled over rows of `a` with a 1-D 'parallel' grid."""
    M, K = a.shape
    Kw, Cout = w.shape
    assert K == Kw
    Mp = pl.cdiv(M, tm) * tm
    if Mp != M:                               # pad rows so TM | M (zeros -> sliced off)
        a = jnp.pad(a, ((0, Mp - M), (0, 0)))
    out = pl.pallas_call(
        _matmul_bias_kernel,
        out_shape=jax.ShapeDtypeStruct((Mp, Cout), a.dtype),
        grid=(Mp // tm,),
        in_specs=[
            pl.BlockSpec((tm, K), lambda i: (i, 0)),    # streamed row tiles
            pl.BlockSpec((K, Cout), lambda i: (0, 0)),  # weight stays resident
            pl.BlockSpec((1, Cout), lambda i: (0, 0)),  # bias stays resident
        ],
        out_specs=pl.BlockSpec((tm, Cout), lambda i: (i, 0)),
        compiler_params=pltpu.CompilerParams(
            dimension_semantics=("parallel",),          # megacore / v7x 2-TC split
            vmem_limit_bytes=32 * 1024 * 1024,
        ),
    )(a, w, b.reshape(1, Cout))
    return out[:M] if Mp != M else out


# ------------------------------ JAX-side glue ------------------------------- #

def _im2col(x_nhwc, kh, kw, pad):
    """Patch matrix for a stride-1 KHxKW conv with symmetric zero padding.

    Returns (N*H*W, KH*KW*C); column order is (tap_h, tap_w, channel), matching
    an HWIO weight reshaped to (KH*KW*C, Cout)."""
    N, H, W, C = x_nhwc.shape
    xp = jnp.pad(x_nhwc, ((0, 0), (pad, pad), (pad, pad), (0, 0)))
    cols = []
    for i in range(kh):
        for j in range(kw):
            cols.append(xp[:, i:i + H, j:j + W, :])
    patches = jnp.concatenate(cols, axis=-1)            # (N, H, W, KH*KW*C)
    return patches.reshape(N * H * W, kh * kw * C)


# --------------------------- parameters / module ---------------------------- #

def init_conv_params(key, cin, cout, kh, kw):
    """PyTorch Conv2d default init: uniform(+-1/sqrt(fan_in)), HWIO layout."""
    k1, k2 = jax.random.split(key)
    bound = 1.0 / np.sqrt(cin * kh * kw)
    w = jax.random.uniform(k1, (kh, kw, cin, cout), jnp.float32, -bound, bound)
    b = jax.random.uniform(k2, (cout,), jnp.float32, -bound, bound)
    return w, b


def init_inception_a_params(key, in_channels):
    keys = jax.random.split(key, 7)
    return {
        "branch1x1":   init_conv_params(keys[0], in_channels, 16, 1, 1),
        "branch5x5_1": init_conv_params(keys[1], in_channels, 16, 1, 1),
        "branch5x5_2": init_conv_params(keys[2], 16, 24, 5, 5),
        "branch3x3_1": init_conv_params(keys[3], in_channels, 16, 1, 1),
        "branch3x3_2": init_conv_params(keys[4], 16, 24, 3, 3),
        "branch3x3_3": init_conv_params(keys[5], 24, 24, 3, 3),
        "branch_pool": init_conv_params(keys[6], in_channels, 24, 1, 1),
    }


def inception_a_forward(params, x_nchw):
    """Matches InceptionA.forward: NCHW in, NCHW out with 16+24+24+24=88 channels."""
    x = jnp.transpose(x_nchw, (0, 2, 3, 1))             # NCHW -> NHWC
    N, H, W, Cin = x.shape
    M = N * H * W

    # ---- Stage 1 (ONE fused 3x3 conv / matmul, 72 output channels) -------- #
    #   cols  0..15 : branch1x1     (1x1 weights placed on the centre tap)
    #   cols 16..31 : branch5x5_1   (1x1, centre tap)
    #   cols 32..47 : branch3x3_1   (1x1, centre tap)
    #   cols 48..71 : branch_pool   (avg_pool3x3 + 1x1  ==  3x3 conv with w/9)
    w1, b1 = params["branch1x1"]
    w5a, b5a = params["branch5x5_1"]
    w3a, b3a = params["branch3x3_1"]
    wp, bp = params["branch_pool"]

    W1 = jnp.zeros((3, 3, Cin, 72), jnp.float32)
    W1 = W1.at[1, 1, :, 0:16].set(w1[0, 0])
    W1 = W1.at[1, 1, :, 16:32].set(w5a[0, 0])
    W1 = W1.at[1, 1, :, 32:48].set(w3a[0, 0])
    W1 = W1.at[:, :, :, 48:72].set(
        jnp.broadcast_to(wp[0, 0] / 9.0, (3, 3, Cin, 24)))
    B1 = jnp.concatenate([b1, b5a, b3a, bp])

    p1 = _im2col(x, 3, 3, 1)                             # (M, 9*Cin)
    s1 = matmul_bias(p1, W1.reshape(9 * Cin, 72), B1)    # (M, 72)

    b1x1 = s1[:, 0:16]
    b5_1 = s1[:, 16:32].reshape(N, H, W, 16)
    b3_1 = s1[:, 32:48].reshape(N, H, W, 16)
    bpool = s1[:, 48:72]

    # ---- branch5x5: 5x5 conv, pad 2  ->  one K=400 matmul ------------------ #
    w5b, b5b = params["branch5x5_2"]
    b5 = matmul_bias(_im2col(b5_1, 5, 5, 2), w5b.reshape(25 * 16, 24), b5b)

    # ---- branch3x3: two 3x3 convs, pad 1  ->  K=144 and K=216 matmuls ------ #
    w3b, b3b = params["branch3x3_2"]
    b3 = matmul_bias(_im2col(b3_1, 3, 3, 1), w3b.reshape(9 * 16, 24), b3b)
    w3c, b3c = params["branch3x3_3"]
    b3 = matmul_bias(_im2col(b3.reshape(N, H, W, 24), 3, 3, 1),
                     w3c.reshape(9 * 24, 24), b3c)

    # ---- concat (dim=1 in NCHW) and back to NCHW --------------------------- #
    out = jnp.concatenate([b1x1, b5, b3, bpool], axis=-1).reshape(N, H, W, 88)
    return jnp.transpose(out, (0, 3, 1, 2))


# ------------------------------ pure-JAX ref -------------------------------- #

def _ref_conv(x_nhwc, w, b, pad):
    y = jax.lax.conv_general_dilated(
        x_nhwc, w, window_strides=(1, 1),
        padding=[(pad, pad), (pad, pad)],
        dimension_numbers=("NHWC", "HWIO", "NHWC"),
    )
    return y + b


def _ref_avg_pool(x_nhwc):
    s = jax.lax.reduce_window(
        x_nhwc, 0.0, jax.lax.add,
        window_dimensions=(1, 3, 3, 1), window_strides=(1, 1, 1, 1),
        padding=((0, 0), (1, 1), (1, 1), (0, 0)),
    )
    return s / 9.0


def _ref_forward(params, x_nchw):
    x = jnp.transpose(x_nchw, (0, 2, 3, 1))
    b1 = _ref_conv(x, *params["branch1x1"], pad=0)
    b5 = _ref_conv(x, *params["branch5x5_1"], pad=0)
    b5 = _ref_conv(b5, *params["branch5x5_2"], pad=2)
    b3 = _ref_conv(x, *params["branch3x3_1"], pad=0)
    b3 = _ref_conv(b3, *params["branch3x3_2"], pad=1)
    b3 = _ref_conv(b3, *params["branch3x3_3"], pad=1)
    bp = _ref_conv(_ref_avg_pool(x), *params["branch_pool"], pad=0)
    out = jnp.concatenate([b1, b5, b3, bp], axis=-1)
    return jnp.transpose(out, (0, 3, 1, 2))


# --------------------------------- main ------------------------------------ #

if __name__ == "__main__":
    key = jax.random.PRNGKey(0)
    kx, kp = jax.random.split(key)

    N, C, H, W = 2, 4, 16, 16                            # small NCHW input
    x = jax.random.normal(kx, (N, C, H, W), jnp.float32)
    params = init_inception_a_params(kp, in_channels=C)

    fwd = jax.jit(inception_a_forward)
    out = jax.block_until_ready(fwd(params, x))
    assert out.shape == (N, 16 + 24 + 24 + 24, H, W), out.shape

    ref = jax.block_until_ready(_ref_forward(params, x))
    np.testing.assert_allclose(np.asarray(out), np.asarray(ref),
                               rtol=1e-4, atol=1e-4)

    print("KERNEL_OK")
</pallas_src>

<mosaic_0001>
module attributes {stable_mosaic.version = 11 : i64} {
  func.func @_matmul_bias_kernel(%arg0: i32, %arg1: memref<256x36xf32, #tpu.memory_space<vmem>>, %arg2: memref<36x72xf32, #tpu.memory_space<vmem>>, %arg3: memref<1x72xf32, #tpu.memory_space<vmem>>, %arg4: memref<256x72xf32, #tpu.memory_space<vmem>>) attributes {dimension_semantics = [#tpu.dimension_semantics<parallel>], iteration_bounds = array<i64: 2>, scalar_prefetch = 0 : i64, scratch_operands = 0 : i64, tpu.core_type = #tpu.core_type<tc>, window_params = [{transform_indices = @transform_0, window_bounds = array<i64: 256, 36>}, {pipeline_mode = #tpu.pipeline_mode<synchronous>, transform_indices = @transform_1, window_bounds = array<i64: 36, 72>}, {pipeline_mode = #tpu.pipeline_mode<synchronous>, transform_indices = @transform_2, window_bounds = array<i64: 1, 72>}, {transform_indices = @transform_3, window_bounds = array<i64: 256, 72>}]} {
    %c0 = arith.constant 0 : index
    %c0_0 = arith.constant 0 : index
    %0 = vector.load %arg1[%c0, %c0_0] : memref<256x36xf32, #tpu.memory_space<vmem>>, vector<256x36xf32>
    %c0_1 = arith.constant 0 : index
    %c0_2 = arith.constant 0 : index
    %1 = vector.load %arg2[%c0_1, %c0_2] : memref<36x72xf32, #tpu.memory_space<vmem>>, vector<36x72xf32>
    %cst = arith.constant dense<0.000000e+00> : vector<256x72xf32>
    %2 = tpu.matmul %0, %1, %cst {dimension_numbers = #tpu.dot_dimension_numbers<[1], [0], [0], [1], [0, 0, 1, 1], [], []>} : vector<256x36xf32>, vector<36x72xf32>, vector<256x72xf32> -> vector<256x72xf32>
    %c0_3 = arith.constant 0 : index
    %c0_4 = arith.constant 0 : index
    %3 = vector.load %arg3[%c0_3, %c0_4] : memref<1x72xf32, #tpu.memory_space<vmem>>, vector<1x72xf32>
    %4 = vector.broadcast %3 : vector<1x72xf32> to vector<256x72xf32>
    %5 = arith.addf %2, %4 : vector<256x72xf32>
    %c0_5 = arith.constant 0 : index
    %c0_6 = arith.constant 0 : index
    %6 = vector.load %arg4[%c0_5, %c0_6] : memref<256x72xf32, #tpu.memory_space<vmem>>, vector<256x72xf32>
    tpu.vector_store %arg4[%c0_5, %c0_6], %5 {strides = array<i32>} : memref<256x72xf32, #tpu.memory_space<vmem>>, vector<256x72xf32>,
    return
  }
  func.func @transform_0(%arg0: i32) -> (i32, i32) {
    %c0_i32 = arith.constant 0 : i32
    %c0_i32_0 = arith.constant 0 : i32
    return %arg0, %c0_i32 : i32, i32
  }
  func.func @transform_1(%arg0: i32) -> (i32, i32) {
    %c0_i32 = arith.constant 0 : i32
    %c0_i32_0 = arith.constant 0 : i32
    %c0_i32_1 = arith.constant 0 : i32
    return %c0_i32, %c0_i32_0 : i32, i32
  }
  func.func @transform_2(%arg0: i32) -> (i32, i32) {
    %c0_i32 = arith.constant 0 : i32
    %c0_i32_0 = arith.constant 0 : i32
    %c0_i32_1 = arith.constant 0 : i32
    return %c0_i32, %c0_i32_0 : i32, i32
  }
  func.func @transform_3(%arg0: i32) -> (i32, i32) {
    %c0_i32 = arith.constant 0 : i32
    %c0_i32_0 = arith.constant 0 : i32
    return %arg0, %c0_i32 : i32, i32
  }
}

module attributes {stable_mosaic.version = 11 : i64} {
  func.func @_matmul_bias_kernel(%arg0: i32, %arg1: memref<256x144xf32, #tpu.memory_space<vmem>>, %arg2: memref<144x24xf32, #tpu.memory_space<vmem>>, %arg3: memref<1x24xf32, #tpu.memory_space<vmem>>, %arg4: memref<256x24xf32, #tpu.memory_space<vmem>>) attributes {dimension_semantics = [#tpu.dimension_semantics<parallel>], iteration_bounds = array<i64: 2>, scalar_prefetch = 0 : i64, scratch_operands = 0 : i64, tpu.core_type = #tpu.core_type<tc>, window_params = [{transform_indices = @transform_0, window_bounds = array<i64: 256, 144>}, {pipeline_mode = #tpu.pipeline_mode<synchronous>, transform_indices = @transform_1, window_bounds = array<i64: 144, 24>}, {pipeline_mode = #tpu.pipeline_mode<synchronous>, transform_indices = @transform_2, window_bounds = array<i64: 1, 24>}, {transform_indices = @transform_3, window_bounds = array<i64: 256, 24>}]} {
    %c0 = arith.constant 0 : index
    %c0_0 = arith.constant 0 : index
    %0 = vector.load %arg1[%c0, %c0_0] : memref<256x144xf32, #tpu.memory_space<vmem>>, vector<256x144xf32>
    %c0_1 = arith.constant 0 : index
    %c0_2 = arith.constant 0 : index
    %1 = vector.load %arg2[%c0_1, %c0_2] : memref<144x24xf32, #tpu.memory_space<vmem>>, vector<144x24xf32>
    %cst = arith.constant dense<0.000000e+00> : vector<256x24xf32>
    %2 = tpu.matmul %0, %1, %cst {dimension_numbers = #tpu.dot_dimension_numbers<[1], [0], [0], [1], [0, 0, 1, 1], [], []>} : vector<256x144xf32>, vector<144x24xf32>, vector<256x24xf32> -> vector<256x24xf32>
    %c0_3 = arith.constant 0 : index
    %c0_4 = arith.constant 0 : index
    %3 = vector.load %arg3[%c0_3, %c0_4] : memref<1x24xf32, #tpu.memory_space<vmem>>, vector<1x24xf32>
    %4 = vector.broadcast %3 : vector<1x24xf32> to vector<256x24xf32>
    %5 = arith.addf %2, %4 : vector<256x24xf32>
    %c0_5 = arith.constant 0 : index
    %c0_6 = arith.constant 0 : index
    %6 = vector.load %arg4[%c0_5, %c0_6] : memref<256x24xf32, #tpu.memory_space<vmem>>, vector<256x24xf32>
    tpu.vector_store %arg4[%c0_5, %c0_6], %5 {strides = array<i32>} : memref<256x24xf32, #tpu.memory_space<vmem>>, vector<256x24xf32>,
    return
  }
  func.func @transform_0(%arg0: i32) -> (i32, i32) {
    %c0_i32 = arith.constant 0 : i32
    %c0_i32_0 = arith.constant 0 : i32
    return %arg0, %c0_i32 : i32, i32
  }
  func.func @transform_1(%arg0: i32) -> (i32, i32) {
    %c0_i32 = arith.constant 0 : i32
    %c0_i32_0 = arith.constant 0 : i32
    %c0_i32_1 = arith.constant 0 : i32
    return %c0_i32, %c0_i32_0 : i32, i32
  }
  func.func @transform_2(%arg0: i32) -> (i32, i32) {
    %c0_i32 = arith.constant 0 : i32
    %c0_i32_0 = arith.constant 0 : i32
    %c0_i32_1 = arith.constant 0 : i32
    return %c0_i32, %c0_i32_0 : i32, i32
  }
  func.func @transform_3(%arg0: i32) -> (i32, i32) {
    %c0_i32 = arith.constant 0 : i32
    %c0_i32_0 = arith.constant 0 : i32
    return %arg0, %c0_i32 : i32, i32
  }
}

module attributes {stable_mosaic.version = 11 : i64} {
  func.func @_matmul_bias_kernel(%arg0: i32, %arg1: memref<256x216xf32, #tpu.memory_space<vmem>>, %arg2: memref<216x24xf32, #tpu.memory_space<vmem>>, %arg3: memref<1x24xf32, #tpu.memory_space<vmem>>, %arg4: memref<256x24xf32, #tpu.memory_space<vmem>>) attributes {dimension_semantics = [#tpu.dimension_semantics<parallel>], iteration_bounds = array<i64: 2>, scalar_prefetch = 0 : i64, scratch_operands = 0 : i64, tpu.core_type = #tpu.core_type<tc>, window_params = [{transform_indices = @transform_0, window_bounds = array<i64: 256, 216>}, {pipeline_mode = #tpu.pipeline_mode<synchronous>, transform_indices = @transform_1, window_bounds = array<i64: 216, 24>}, {pipeline_mode = #tpu.pipeline_mode<synchronous>, transform_indices = @transform_2, window_bounds = array<i64: 1, 24>}, {transform_indices = @transform_3, window_bounds = array<i64: 256, 24>}]} {
    %c0 = arith.constant 0 : index
    %c0_0 = arith.constant 0 : index
    %0 = vector.load %arg1[%c0, %c0_0] : memref<256x216xf32, #tpu.memory_space<vmem>>, vector<256x216xf32>
    %c0_1 = arith.constant 0 : index
    %c0_2 = arith.constant 0 : index
    %1 = vector.load %arg2[%c0_1, %c0_2] : memref<216x24xf32, #tpu.memory_space<vmem>>, vector<216x24xf32>
    %cst = arith.constant dense<0.000000e+00> : vector<256x24xf32>
    %2 = tpu.matmul %0, %1, %cst {dimension_numbers = #tpu.dot_dimension_numbers<[1], [0], [0], [1], [0, 0, 1, 1], [], []>} : vector<256x216xf32>, vector<216x24xf32>, vector<256x24xf32> -> vector<256x24xf32>
    %c0_3 = arith.constant 0 : index
    %c0_4 = arith.constant 0 : index
    %3 = vector.load %arg3[%c0_3, %c0_4] : memref<1x24xf32, #tpu.memory_space<vmem>>, vector<1x24xf32>
    %4 = vector.broadcast %3 : vector<1x24xf32> to vector<256x24xf32>
    %5 = arith.addf %2, %4 : vector<256x24xf32>
    %c0_5 = arith.constant 0 : index
    %c0_6 = arith.constant 0 : index
    %6 = vector.load %arg4[%c0_5, %c0_6] : memref<256x24xf32, #tpu.memory_space<vmem>>, vector<256x24xf32>
    tpu.vector_store %arg4[%c0_5, %c0_6], %5 {strides = array<i32>} : memref<256x24xf32, #tpu.memory_space<vmem>>, vector<256x24xf32>,
    return
  }
  func.func @transform_0(%arg0: i32) -> (i32, i32) {
    %c0_i32 = arith.constant 0 : i32
    %c0_i32_0 = arith.constant 0 : i32
    return %arg0, %c0_i32 : i32, i32
  }
  func.func @transform_1(%arg0: i32) -> (i32, i32) {
    %c0_i32 = arith.constant 0 : i32
    %c0_i32_0 = arith.constant 0 : i32
    %c0_i32_1 = arith.constant 0 : i32
    return %c0_i32, %c0_i32_0 : i32, i32
  }
  func.func @transform_2(%arg0: i32) -> (i32, i32) {
    %c0_i32 = arith.constant 0 : i32
    %c0_i32_0 = arith.constant 0 : i32
    %c0_i32_1 = arith.constant 0 : i32
    return %c0_i32, %c0_i32_0 : i32, i32
  }
  func.func @transform_3(%arg0: i32) -> (i32, i32) {
    %c0_i32 = arith.constant 0 : i32
    %c0_i32_0 = arith.constant 0 : i32
    return %arg0, %c0_i32 : i32, i32
  }
}

module attributes {stable_mosaic.version = 11 : i64} {
  func.func @_matmul_bias_kernel(%arg0: i32, %arg1: memref<256x400xf32, #tpu.memory_space<vmem>>, %arg2: memref<400x24xf32, #tpu.memory_space<vmem>>, %arg3: memref<1x24xf32, #tpu.memory_space<vmem>>, %arg4: memref<256x24xf32, #tpu.memory_space<vmem>>) attributes {dimension_semantics = [#tpu.dimension_semantics<parallel>], iteration_bounds = array<i64: 2>, scalar_prefetch = 0 : i64, scratch_operands = 0 : i64, tpu.core_type = #tpu.core_type<tc>, window_params = [{transform_indices = @transform_0, window_bounds = array<i64: 256, 400>}, {pipeline_mode = #tpu.pipeline_mode<synchronous>, transform_indices = @transform_1, window_bounds = array<i64: 400, 24>}, {pipeline_mode = #tpu.pipeline_mode<synchronous>, transform_indices = @transform_2, window_bounds = array<i64: 1, 24>}, {transform_indices = @transform_3, window_bounds = array<i64: 256, 24>}]} {
    %c0 = arith.constant 0 : index
    %c0_0 = arith.constant 0 : index
    %0 = vector.load %arg1[%c0, %c0_0] : memref<256x400xf32, #tpu.memory_space<vmem>>, vector<256x400xf32>
    %c0_1 = arith.constant 0 : index
    %c0_2 = arith.constant 0 : index
    %1 = vector.load %arg2[%c0_1, %c0_2] : memref<400x24xf32, #tpu.memory_space<vmem>>, vector<400x24xf32>
    %cst = arith.constant dense<0.000000e+00> : vector<256x24xf32>
    %2 = tpu.matmul %0, %1, %cst {dimension_numbers = #tpu.dot_dimension_numbers<[1], [0], [0], [1], [0, 0, 1, 1], [], []>} : vector<256x400xf32>, vector<400x24xf32>, vector<256x24xf32> -> vector<256x24xf32>
    %c0_3 = arith.constant 0 : index
    %c0_4 = arith.constant 0 : index
    %3 = vector.load %arg3[%c0_3, %c0_4] : memref<1x24xf32, #tpu.memory_space<vmem>>, vector<1x24xf32>
    %4 = vector.broadcast %3 : vector<1x24xf32> to vector<256x24xf32>
    %5 = arith.addf %2, %4 : vector<256x24xf32>
    %c0_5 = arith.constant 0 : index
    %c0_6 = arith.constant 0 : index
    %6 = vector.load %arg4[%c0_5, %c0_6] : memref<256x24xf32, #tpu.memory_space<vmem>>, vector<256x24xf32>
    tpu.vector_store %arg4[%c0_5, %c0_6], %5 {strides = array<i32>} : memref<256x24xf32, #tpu.memory_space<vmem>>, vector<256x24xf32>,
    return
  }
  func.func @transform_0(%arg0: i32) -> (i32, i32) {
    %c0_i32 = arith.constant 0 : i32
    %c0_i32_0 = arith.constant 0 : i32
    return %arg0, %c0_i32 : i32, i32
  }
  func.func @transform_1(%arg0: i32) -> (i32, i32) {
    %c0_i32 = arith.constant 0 : i32
    %c0_i32_0 = arith.constant 0 : i32
    %c0_i32_1 = arith.constant 0 : i32
    return %c0_i32, %c0_i32_0 : i32, i32
  }
  func.func @transform_2(%arg0: i32) -> (i32, i32) {
    %c0_i32 = arith.constant 0 : i32
    %c0_i32_0 = arith.constant 0 : i32
    %c0_i32_1 = arith.constant 0 : i32
    return %c0_i32, %c0_i32_0 : i32, i32
  }
  func.func @transform_3(%arg0: i32) -> (i32, i32) {
    %c0_i32 = arith.constant 0 : i32
    %c0_i32_0 = arith.constant 0 : i32
    return %arg0, %c0_i32 : i32, i32
  }
}

</mosaic_0001>

<bundles_post_ra>
// kernel: inception_a_forward.4
= control target key start
LH: loop header
LB: loop body
LE: loop exit
PB: predicated region body
PF: predicated region fallthrough
CT: control target
= control target key end

     0   :  { %s819_s12 = smov 0   ;;  %s1027_s0 = inlined_call_operand.vmem [shape: f32[512,36], index: 0, kind: input, shape index: {}]   ;;  %s1028_s1 = inlined_call_operand.vmem [shape: f32[36,72], index: 1, kind: input, shape index: {}]   ;;  %s1029_s2 = inlined_call_operand.vmem [shape: f32[1,72], index: 2, kind: input, shape index: {}]   ;;  %s1030_s3 = inlined_call_operand.vmem [shape: f32[512,72], index: 3, kind: output, shape index: {}]  }
   0x1 LB: > { %s633_s13 = sadd.s32 4294967295, %s797_s12   ;;  %p637_p0 = scmp.ge.s32.totalorder %s797_s12, 1  ;;  %s797_s12 = sphi %s819_s12, %s13_s12  }
   0x2   : > { %p138_p1 = scmp.lt.s32.totalorder %s797_s12, 3 }
   0x4   : > { %p139_p2 = pnand %p637_p0, %p138_p1 }
   0x5   : > { %s638_s18 = sshll.u32 (!%p139_p2), %s633_s13, 5 }
   0x6   : > { %142 = sbr.rel (%p139_p2) target bundleno = 249 (0xf9), region = 32  ;;  %p163_p3 = scmp.lt.s32.totalorder (!%p139_p2), %s638_s18, 63 }
   0xb   : > { %v210_v0 = vld [vmem:[%s1028_s1 + $0x20] sm:$0xf]  ;;  %vm315_vm0 = vcmask 1043456   ;;  %v209_v1 = vld [vmem:[%s1028_s1 + $0x18] sm:$0xff]  ;;  %v208_v2 = vld [vmem:[%s1028_s1 + $0x10] sm:$0xff]  ;;  %s1032_s18 = smov (!%p163_p3, %s638_s18), 63 }
   0xc   : > { %715 = vmatprep.subr.msk.mxu0 %vm315_vm0, %v210_v0  ;;  %773 = vmatprep.subr.msk.mxu1 %vm315_vm0, %v210_v0  ;;  %v207_v3 = vld [vmem:[%s1028_s1 + $0x8] sm:$0xff]  ;;  %s639_s23 = sshll.u32 %s1032_s18, 3  ;;  %v206_v4 = vld [vmem:[%s1028_s1] sm:$0xff]  ;;  %vm218_vm1 = vcmask 293888   ;;  %vm544_vm2 = vcmask 588800  }
   0xd   : > { %716 = vmatpush3.msk.msra.mxu0 %vm315_vm0, %v210_v0  ;;  %778 = vmatpush3.msk.msra.mxu1 %vm315_vm0, %v210_v0  ;;  %s850_s28 = scalar_lea.vmem %s1027_s0, %s639_s23  ;;  %v919_v37 = vld [vmem:[%s1029_s2] ss:$0 sm:$0xff]  ;;  %s926_s6 = scalar_lea.vmem %s1030_s3, %s639_s23 }
   0xe   : > { %717 = vmatprep.subr.mxu0 %v209_v1  ;;  %774 = vmatprep.subr.mxu1 %v209_v1  ;;  %v174_v5 = vld [vmem:[%s850_s28] sm:$0xff]  ;;  %v175_v7 = vld [vmem:[%s850_s28 + $0x8] sm:$0xff]  ;;  %v176_v9 = vld [vmem:[%s850_s28 + $0x10] sm:$0xff] }
   0xf   : > { %718 = vmatpush3.msra.mxu0 %v209_v1  ;;  %779 = vmatpush3.msra.mxu1 %v209_v1  ;;  %v190_v6 = vld [vmem:[%s850_s28 + $0x80] sm:$0xff]  ;;  %v191_v8 = vld [vmem:[%s850_s28 + $0x88] sm:$0xff]  ;;  %v192_v10 = vld [vmem:[%s850_s28 + $0x90] sm:$0xff] }
  0x10   : > { %719 = vmatprep.subr.mxu0 %v208_v2  ;;  %775 = vmatprep.subr.mxu1 %v208_v2  ;;  %v177_v11 = vld [vmem:[%s850_s28 + $0x18] sm:$0xff]  ;;  %v178_v13 = vld [vmem:[%s850_s28 + $0x20] sm:$0xff]  ;;  %v179_v15 = vld [vmem:[%s850_s28 + $0x28] sm:$0xff] }
  0x11   : > { %720 = vmatpush3.msra.mxu0 %v208_v2  ;;  %780 = vmatpush3.msra.mxu1 %v208_v2  ;;  %v193_v12 = vld [vmem:[%s850_s28 + $0x98] sm:$0xff]  ;;  %v194_v14 = vld [vmem:[%s850_s28 + $0xa0] sm:$0xff]  ;;  %v195_v16 = vld [vmem:[%s850_s28 + $0xa8] sm:$0xff] }
  0x12   : > { %721 = vmatprep.subr.mxu0 %v207_v3  ;;  %776 = vmatprep.subr.mxu1 %v207_v3  ;;  %v180_v17 = vld [vmem:[%s850_s28 + $0x30] sm:$0xff]  ;;  %v181_v19 = vld [vmem:[%s850_s28 + $0x38] sm:$0xff]  ;;  %v182_v21 = vld [vmem:[%s850_s28 + $0x40] sm:$0xff] }
  0x13   : > { %722 = vmatpush3.msra.mxu0 %v207_v3  ;;  %781 = vmatpush3.msra.mxu1 %v207_v3  ;;  %v196_v18 = vld [vmem:[%s850_s28 + $0xb0] sm:$0xff]  ;;  %v197_v20 = vld [vmem:[%s850_s28 + $0xb8] sm:$0xff]  ;;  %v198_v22 = vld [vmem:[%s850_s28 + $0xc0] sm:$0xff] }
  0x14   : > { %723 = vmatprep.subr.mxu0 %v206_v4  ;;  %777 = vmatprep.subr.mxu1 %v206_v4  ;;  %v183_v23 = vld [vmem:[%s850_s28 + $0x48] sm:$0xff]  ;;  %v184_v25 = vld [vmem:[%s850_s28 + $0x50] sm:$0xff]  ;;  %v185_v27 = vld [vmem:[%s850_s28 + $0x58] sm:$0xff] }
  0x15   : > { %724 = vmatpush3.msra.mxu0 %v206_v4  ;;  %782 = vmatpush3.msra.mxu1 %v206_v4  ;;  %v199_v24 = vld [vmem:[%s850_s28 + $0xc8] sm:$0xff]  ;;  %v200_v26 = vld [vmem:[%s850_s28 + $0xd0] sm:$0xff]  ;;  %v201_v28 = vld [vmem:[%s850_s28 + $0xd8] sm:$0xff] }
  0x16   : > { %725 = vmatprep.mubr.msk.f32.mxu0 %vm218_vm1, %v174_v5  ;;  %749 = vmatprep.mubr.msk.f32.mxu1 %vm218_vm1, %v190_v6  ;;  %v186_v29 = vld [vmem:[%s850_s28 + $0x60] sm:$0xff]  ;;  %v187_v31 = vld [vmem:[%s850_s28 + $0x68] sm:$0xff]  ;;  %v188_v33 = vld [vmem:[%s850_s28 + $0x70] sm:$0xff] }
  0x17   : > { %726 = vmatmul.mubr.msk.f32.vlgmr.msra.gmra.mxu0 %vm218_vm1, %v175_v7  ;;  %750 = vmatmul.mubr.msk.f32.vlgmr.msra.gmra.mxu1 %vm218_vm1, %v191_v8  ;;  %v202_v30 = vld [vmem:[%s850_s28 + $0xe0] sm:$0xff]  ;;  %v203_v32 = vld [vmem:[%s850_s28 + $0xe8] sm:$0xff]  ;;  %v204_v34 = vld [vmem:[%s850_s28 + $0xf0] sm:$0xff] }
  0x18   : > { %728 = vmatprep.mubr.msk.f32.mxu0 %vm218_vm1, %v176_v9  ;;  %752 = vmatprep.mubr.msk.f32.mxu1 %vm218_vm1, %v192_v10  ;;  %v189_v35 = vld [vmem:[%s850_s28 + $0x78] sm:$0xff] }
  0x19   : > { %v205_v36 = vld [vmem:[%s850_s28 + $0xf8] sm:$0xff] }
  0x1b   : > { %729 = vmatmul.mubr.msk.f32.gmra.mxu0 %vm218_vm1, %v177_v11  ;;  %753 = vmatmul.mubr.msk.f32.gmra.mxu1 %vm218_vm1, %v193_v12 }
  0x1c   : > { %731 = vmatprep.mubr.msk.f32.mxu0 %vm218_vm1, %v178_v13  ;;  %755 = vmatprep.mubr.msk.f32.mxu1 %vm218_vm1, %v194_v14 }
  0x1f   : > { %732 = vmatmul.mubr.msk.f32.gmra.mxu0 %vm218_vm1, %v179_v15  ;;  %756 = vmatmul.mubr.msk.f32.gmra.mxu1 %vm218_vm1, %v195_v16 }
  0x20   : > { %734 = vmatprep.mubr.msk.f32.mxu0 %vm218_vm1, %v180_v17  ;;  %758 = vmatprep.mubr.msk.f32.mxu1 %vm218_vm1, %v196_v18 }
  0x23   : > { %735 = vmatmul.mubr.msk.f32.gmra.mxu0 %vm218_vm1, %v181_v19  ;;  %759 = vmatmul.mubr.msk.f32.gmra.mxu1 %vm218_vm1, %v197_v20 }
  0x24   : > { %737 = vmatprep.mubr.msk.f32.mxu0 %vm218_vm1, %v182_v21  ;;  %761 = vmatprep.mubr.msk.f32.mxu1 %vm218_vm1, %v198_v22 }
  0x27   : > { %738 = vmatmul.mubr.msk.f32.gmra.mxu0 %vm218_vm1, %v183_v23  ;;  %762 = vmatmul.mubr.msk.f32.gmra.mxu1 %vm218_vm1, %v199_v24 }
  0x28   : > { %740 = vmatprep.mubr.msk.f32.mxu0 %vm218_vm1, %v184_v25  ;;  %764 = vmatprep.mubr.msk.f32.mxu1 %vm218_vm1, %v200_v26 }
  0x2b   : > { %741 = vmatmul.mubr.msk.f32.gmra.mxu0 %vm218_vm1, %v185_v27  ;;  %765 = vmatmul.mubr.msk.f32.gmra.mxu1 %vm218_vm1, %v201_v28 }
  0x2c   : > { %743 = vmatprep.mubr.msk.f32.mxu0 %vm218_vm1, %v186_v29  ;;  %767 = vmatprep.mubr.msk.f32.mxu1 %vm218_vm1, %v202_v30 }
  0x2f   : > { %744 = vmatmul.mubr.msk.f32.gmra.mxu0 %vm218_vm1, %v187_v31  ;;  %768 = vmatmul.mubr.msk.f32.gmra.mxu1 %vm218_vm1, %v203_v32 }
  0x30   : > { %746 = vmatprep.mubr.msk.f32.mxu0 %vm218_vm1, %v188_v33  ;;  %770 = vmatprep.mubr.msk.f32.mxu1 %vm218_vm1, %v204_v34 }
  0x33   : > { %747 = vmatmul.mubr.msk.f32.gmra.mxu0 %vm218_vm1, %v189_v35  ;;  %771 = vmatmul.mubr.msk.f32.gmra.mxu1 %vm218_vm1, %v205_v36 }
  0xd7   : > { %v727_v38 = vpop.f32.mrf.mxu0  ;;  %v751_v39 = vpop.f32.mrf.mxu1 }
  0xd8   : > { %v391_v40 = vadd.f32 %v727_v38, %v919_v37  ;;  %v471_v41 = vadd.f32 %v751_v39, %v919_v37 }
  0xd9   : > { %v385_v42 = vpop.f32.mrf.mxu0  ;;  %v465_v43 = vpop.f32.mrf.mxu1 }
  0xda   : > { %546 = vst.msk [vmem:[%s926_s6 + $0x8] sm:$0xff] %vm544_vm2, %v391_v40  ;;  %562 = vst.msk [vmem:[%s926_s6 + $0x88] sm:$0xff] %vm544_vm2, %v471_v41  ;;  %v386_v44 = vadd.f32 %v919_v37, %v385_v42  ;;  %v466_v45 = vadd.f32 %v919_v37, %v465_v43 }
  0xdb   : > { %v730_v46 = vpop.f32.mrf.mxu0  ;;  %v754_v47 = vpop.f32.mrf.mxu1 }
  0xdc   : > { %545 = vst.msk [vmem:[%s926_s6] sm:$0xff] %vm544_vm2, %v386_v44  ;;  %561 = vst.msk [vmem:[%s926_s6 + $0x80] sm:$0xff] %vm544_vm2, %v466_v45  ;;  %v401_v48 = vadd.f32 %v730_v46, %v919_v37  ;;  %v481_v49 = vadd.f32 %v754_v47, %v919_v37 }
  0xdd   : > { %v395_v50 = vpop.f32.mrf.mxu0  ;;  %v475_v51 = vpop.f32.mrf.mxu1 }
  0xde   : > { %548 = vst.msk [vmem:[%s926_s6 + $0x18] sm:$0xff] %vm544_vm2, %v401_v48  ;;  %564 = vst.msk [vmem:[%s926_s6 + $0x98] sm:$0xff] %vm544_vm2, %v481_v49  ;;  %v396_v52 = vadd.f32 %v919_v37, %v395_v50  ;;  %v476_v53 = vadd.f32 %v919_v37, %v475_v51 }
  0xdf   : > { %v733_v54 = vpop.f32.mrf.mxu0  ;;  %v757_v55 = vpop.f32.mrf.mxu1 }
  0xe0   : > { %547 = vst.msk [vmem:[%s926_s6 + $0x10] sm:$0xff] %vm544_vm2, %v396_v52  ;;  %563 = vst.msk [vmem:[%s926_s6 + $0x90] sm:$0xff] %vm544_vm2, %v476_v53  ;;  %v411_v56 = vadd.f32 %v733_v54, %v919_v37  ;;  %v491_v57 = vadd.f32 %v757_v55, %v919_v37 }
  0xe1   : > { %v405_v58 = vpop.f32.mrf.mxu0  ;;  %v485_v59 = vpop.f32.mrf.mxu1 }
  0xe2   : > { %550 = vst.msk [vmem:[%s926_s6 + $0x28] sm:$0xff] %vm544_vm2, %v411_v56  ;;  %566 = vst.msk [vmem:[%s926_s6 + $0xa8] sm:$0xff] %vm544_vm2, %v491_v57  ;;  %v406_v60 = vadd.f32 %v919_v37, %v405_v58  ;;  %v486_v61 = vadd.f32 %v919_v37, %v485_v59 }
  0xe3   : > { %v736_v62 = vpop.f32.mrf.mxu0  ;;  %v760_v63 = vpop.f32.mrf.mxu1 }
  0xe4   : > { %549 = vst.msk [vmem:[%s926_s6 + $0x20] sm:$0xff] %vm544_vm2, %v406_v60  ;;  %565 = vst.msk [vmem:[%s926_s6 + $0xa0] sm:$0xff] %vm544_vm2, %v486_v61  ;;  %v421_v0 = vadd.f32 %v736_v62, %v919_v37  ;;  %v501_v1 = vadd.f32 %v760_v63, %v919_v37 }
  0xe5   : > { %v415_v2 = vpop.f32.mrf.mxu0  ;;  %v495_v3 = vpop.f32.mrf.mxu1 }
  0xe6   : > { %552 = vst.msk [vmem:[%s926_s6 + $0x38] sm:$0xff] %vm544_vm2, %v421_v0  ;;  %568 = vst.msk [vmem:[%s926_s6 + $0xb8] sm:$0xff] %vm544_vm2, %v501_v1  ;;  %v416_v4 = vadd.f32 %v919_v37, %v415_v2  ;;  %v496_v5 = vadd.f32 %v919_v37, %v495_v3 }
  0xe7   : > { %v739_v6 = vpop.f32.mrf.mxu0  ;;  %v763_v7 = vpop.f32.mrf.mxu1 }
  0xe8   : > { %551 = vst.msk [vmem:[%s926_s6 + $0x30] sm:$0xff] %vm544_vm2, %v416_v4  ;;  %567 = vst.msk [vmem:[%s926_s6 + $0xb0] sm:$0xff] %vm544_vm2, %v496_v5  ;;  %v431_v8 = vadd.f32 %v739_v6, %v919_v37  ;;  %v511_v9 = vadd.f32 %v763_v7, %v919_v37 }
  0xe9   : > { %v425_v10 = vpop.f32.mrf.mxu0  ;;  %v505_v11 = vpop.f32.mrf.mxu1 }
  0xea   : > { %554 = vst.msk [vmem:[%s926_s6 + $0x48] sm:$0xff] %vm544_vm2, %v431_v8  ;;  %570 = vst.msk [vmem:[%s926_s6 + $0xc8] sm:$0xff] %vm544_vm2, %v511_v9  ;;  %v426_v12 = vadd.f32 %v919_v37, %v425_v10  ;;  %v506_v13 = vadd.f32 %v919_v37, %v505_v11 }
  0xeb   : > { %v742_v14 = vpop.f32.mrf.mxu0  ;;  %v766_v15 = vpop.f32.mrf.mxu1 }
  0xec   : > { %553 = vst.msk [vmem:[%s926_s6 + $0x40] sm:$0xff] %vm544_vm2, %v426_v12  ;;  %569 = vst.msk [vmem:[%s926_s6 + $0xc0] sm:$0xff] %vm544_vm2, %v506_v13  ;;  %v441_v16 = vadd.f32 %v742_v14, %v919_v37  ;;  %v521_v17 = vadd.f32 %v766_v15, %v919_v37 }
  0xed   : > { %v435_v18 = vpop.f32.mrf.mxu0  ;;  %v515_v19 = vpop.f32.mrf.mxu1 }
  0xee   : > { %556 = vst.msk [vmem:[%s926_s6 + $0x58] sm:$0xff] %vm544_vm2, %v441_v16  ;;  %572 = vst.msk [vmem:[%s926_s6 + $0xd8] sm:$0xff] %vm544_vm2, %v521_v17  ;;  %v436_v20 = vadd.f32 %v919_v37, %v435_v18  ;;  %v516_v21 = vadd.f32 %v919_v37, %v515_v19 }
  0xef   : > { %v745_v22 = vpop.f32.mrf.mxu0  ;;  %v769_v23 = vpop.f32.mrf.mxu1 }
  0xf0   : > { %555 = vst.msk [vmem:[%s926_s6 + $0x50] sm:$0xff] %vm544_vm2, %v436_v20  ;;  %571 = vst.msk [vmem:[%s926_s6 + $0xd0] sm:$0xff] %vm544_vm2, %v516_v21  ;;  %v451_v24 = vadd.f32 %v745_v22, %v919_v37  ;;  %v531_v25 = vadd.f32 %v769_v23, %v919_v37 }
  0xf1   : > { %v445_v26 = vpop.f32.mrf.mxu0  ;;  %v525_v27 = vpop.f32.mrf.mxu1 }
  0xf2   : > { %558 = vst.msk [vmem:[%s926_s6 + $0x68] sm:$0xff] %vm544_vm2, %v451_v24  ;;  %574 = vst.msk [vmem:[%s926_s6 + $0xe8] sm:$0xff] %vm544_vm2, %v531_v25  ;;  %v446_v28 = vadd.f32 %v919_v37, %v445_v26  ;;  %v526_v29 = vadd.f32 %v919_v37, %v525_v27 }
  0xf3   : > { %v748_v30 = vpop.f32.mrf.mxu0  ;;  %v772_v31 = vpop.f32.mrf.mxu1 }
  0xf4   : > { %557 = vst.msk [vmem:[%s926_s6 + $0x60] sm:$0xff] %vm544_vm2, %v446_v28  ;;  %573 = vst.msk [vmem:[%s926_s6 + $0xe0] sm:$0xff] %vm544_vm2, %v526_v29  ;;  %v461_v32 = vadd.f32 %v748_v30, %v919_v37  ;;  %v541_v33 = vadd.f32 %v772_v31, %v919_v37 }
  0xf5   : > { %v455_v34 = vpop.f32.mrf.mxu0  ;;  %v535_v35 = vpop.f32.mrf.mxu1 }
  0xf6   : > { %560 = vst.msk [vmem:[%s926_s6 + $0x78] sm:$0xff] %vm544_vm2, %v461_v32  ;;  %576 = vst.msk [vmem:[%s926_s6 + $0xf8] sm:$0xff] %vm544_vm2, %v541_v33  ;;  %v456_v36 = vadd.f32 %v919_v37, %v455_v34  ;;  %v536_v38 = vadd.f32 %v919_v37, %v535_v35 }
  0xf8   : > { %559 = vst.msk [vmem:[%s926_s6 + $0x70] sm:$0xff] %vm544_vm2, %v456_v36  ;;  %575 = vst.msk [vmem:[%s926_s6 + $0xf0] sm:$0xff] %vm544_vm2, %v536_v38 }
  0xf9 PF: > { %s13_s12 = sadd.s32 1, %s797_s12  }
  0xfa   : > { %p10_p4 = scmp.ge.s32.totalorder %s13_s12, 4  }
  0xfc   :  { %12 = sbr.rel (!%p10_p4) target bundleno = 1 (0x1), region = 62 }

// kernel: inception_a_forward.6
= control target key start
LH: loop header
LB: loop body
LE: loop exit
PB: predicated region body
PF: predicated region fallthrough
CT: control target
= control target key end

     0   :  { %s797_s12 = smov 0   ;;  %s1111_s0 = inlined_call_operand.vmem [shape: f32[512,144], index: 0, kind: input, shape index: {}]   ;;  %s1112_s1 = inlined_call_operand.vmem [shape: f32[144,24], index: 1, kind: input, shape index: {}]   ;;  %s1113_s2 = inlined_call_operand.vmem [shape: f32[1,24], index: 2, kind: input, shape index: {}]   ;;  %s1114_s3 = inlined_call_operand.vmem [shape: f32[512,24], index: 3, kind: output, shape index: {}]  }
   0x1 LB: > { %s677_s13 = sadd.s32 4294967295, %s774_s12   ;;  %p681_p0 = scmp.ge.s32.totalorder %s774_s12, 1  ;;  %s774_s12 = sphi %s797_s12, %s13_s12  }
   0x2   : > { %p139_p1 = scmp.lt.s32.totalorder %s774_s12, 3 }
   0x4   : > { %p140_p2 = pnand %p681_p0, %p139_p1 }
   0x5   : > { %s682_s7 = sshll.u32 (!%p140_p2), %s677_s13, 5 }
   0x6   : > { %143 = sbr.rel (%p140_p2) target bundleno = 305 (0x131), region = 32  ;;  %p165_p3 = scmp.lt.s32.totalorder (!%p140_p2), %s682_s7, 63 }
   0xb   : > { %v256_v0 = vld [vmem:[%s1112_s1 + $0x78] sm:$0xff]  ;;  %v776_v1 = vmov 0.0   ;;  %v255_v2 = vld [vmem:[%s1112_s1 + $0x70] sm:$0xff]  ;;  %v254_v3 = vld [vmem:[%s1112_s1 + $0x68] sm:$0xff]  ;;  %s1116_s7 = smov (!%p165_p3, %s682_s7), 63  ;;  %vm266_vm0 = vcmask 130048  }
   0xc   : > { %363 = vmatprep.subr.mxu0 %v776_v1  ;;  %723 = vmatprep.subr.mxu1 %v776_v1  ;;  %v253_v4 = vld [vmem:[%s1112_s1 + $0x60] sm:$0xff]  ;;  %v252_v5 = vld [vmem:[%s1112_s1 + $0x58] sm:$0xff]  ;;  %v251_v6 = vld [vmem:[%s1112_s1 + $0x50] sm:$0xff]  ;;  %s722_s19 = sshll.u32 %s1116_s7, 4  ;;  %s686_s29 = sshll.u32 %s1116_s7, 3  ;;  %vm588_vm1 = vcmask 195584  }
   0xd   : > { %364 = vmatpush1.msra.mxu0 %v256_v0  ;;  %741 = vmatpush1.msra.mxu1 %v256_v0  ;;  %v250_v7 = vld [vmem:[%s1112_s1 + $0x48] sm:$0xff]  ;;  %v249_v8 = vld [vmem:[%s1112_s1 + $0x40] sm:$0xff]  ;;  %v248_v9 = vld [vmem:[%s1112_s1 + $0x38] sm:$0xff]  ;;  %s896_s26 = scalar_lea.vmem %s1111_s0, %s722_s19  ;;  %s1010_s8 = scalar_lea.vmem %s1114_s3, %s686_s29 }
   0xe   : > { %365 = vmatprep.subr.mxu0 %v776_v1  ;;  %724 = vmatprep.subr.mxu1 %v776_v1  ;;  %v247_v10 = vld [vmem:[%s1112_s1 + $0x30] sm:$0xff]  ;;  %v246_v11 = vld [vmem:[%s1112_s1 + $0x28] sm:$0xff]  ;;  %v245_v12 = vld [vmem:[%s1112_s1 + $0x20] sm:$0xff] }
   0xf   : > { %366 = vmatpush1.msra.mxu0 %v255_v2  ;;  %742 = vmatpush1.msra.mxu1 %v255_v2  ;;  %v244_v13 = vld [vmem:[%s1112_s1 + $0x18] sm:$0xff]  ;;  %v243_v14 = vld [vmem:[%s1112_s1 + $0x10] sm:$0xff]  ;;  %v242_v15 = vld [vmem:[%s1112_s1 + $0x8] sm:$0xff] }
  0x10   : > { %367 = vmatprep.subr.mxu0 %v776_v1  ;;  %725 = vmatprep.subr.mxu1 %v776_v1  ;;  %v241_v16 = vld [vmem:[%s1112_s1] sm:$0xff]  ;;  %v258_v17 = vld [vmem:[%s1112_s1 + $0x88] sm:$0xff]  ;;  %v180_v23 = vld [vmem:[%s896_s26 + $0x18] sm:$0xff] }
  0x11   : > { %368 = vmatpush1.msra.mxu0 %v254_v3  ;;  %743 = vmatpush1.msra.mxu1 %v254_v3  ;;  %v257_v18 = vld [vmem:[%s1112_s1 + $0x80] sm:$0xff]  ;;  %v178_v19 = vld [vmem:[%s896_s26 + $0x8] sm:$0xff]  ;;  %v212_v24 = vld [vmem:[%s896_s26 + $0x118] sm:$0xff] }
  0x12   : > { %369 = vmatprep.subr.mxu0 %v776_v1  ;;  %726 = vmatprep.subr.mxu1 %v776_v1  ;;  %v210_v20 = vld [vmem:[%s896_s26 + $0x108] sm:$0xff]  ;;  %v177_v21 = vld [vmem:[%s896_s26] sm:$0xff]  ;;  %v179_v25 = vld [vmem:[%s896_s26 + $0x10] sm:$0xff] }
  0x13   : > { %370 = vmatpush1.msra.mxu0 %v253_v4  ;;  %744 = vmatpush1.msra.mxu1 %v253_v4  ;;  %v209_v22 = vld [vmem:[%s896_s26 + $0x100] sm:$0xff]  ;;  %v211_v26 = vld [vmem:[%s896_s26 + $0x110] sm:$0xff]  ;;  %v182_v27 = vld [vmem:[%s896_s26 + $0x28] sm:$0xff] }
  0x14   : > { %371 = vmatprep.subr.mxu0 %v776_v1  ;;  %727 = vmatprep.subr.mxu1 %v776_v1  ;;  %v214_v28 = vld [vmem:[%s896_s26 + $0x128] sm:$0xff]  ;;  %v181_v29 = vld [vmem:[%s896_s26 + $0x20] sm:$0xff]  ;;  %v184_v31 = vld [vmem:[%s896_s26 + $0x38] sm:$0xff] }
  0x15   : > { %372 = vmatpush1.msra.mxu0 %v252_v5  ;;  %745 = vmatpush1.msra.mxu1 %v252_v5  ;;  %v213_v30 = vld [vmem:[%s896_s26 + $0x120] sm:$0xff]  ;;  %v216_v32 = vld [vmem:[%s896_s26 + $0x138] sm:$0xff]  ;;  %v183_v33 = vld [vmem:[%s896_s26 + $0x30] sm:$0xff] }
  0x16   : > { %373 = vmatprep.subr.mxu0 %v776_v1  ;;  %728 = vmatprep.subr.mxu1 %v776_v1  ;;  %v215_v34 = vld [vmem:[%s896_s26 + $0x130] sm:$0xff]  ;;  %v186_v35 = vld [vmem:[%s896_s26 + $0x48] sm:$0xff]  ;;  %v185_v37 = vld [vmem:[%s896_s26 + $0x40] sm:$0xff] }
  0x17   : > { %374 = vmatpush1.msra.mxu0 %v251_v6  ;;  %746 = vmatpush1.msra.mxu1 %v251_v6  ;;  %v218_v36 = vld [vmem:[%s896_s26 + $0x148] sm:$0xff]  ;;  %v217_v38 = vld [vmem:[%s896_s26 + $0x140] sm:$0xff]  ;;  %v188_v39 = vld [vmem:[%s896_s26 + $0x58] sm:$0xff] }
  0x18   : > { %375 = vmatprep.subr.mxu0 %v776_v1  ;;  %729 = vmatprep.subr.mxu1 %v776_v1  ;;  %v220_v40 = vld [vmem:[%s896_s26 + $0x158] sm:$0xff]  ;;  %v187_v41 = vld [vmem:[%s896_s26 + $0x50] sm:$0xff]  ;;  %v190_v43 = vld [vmem:[%s896_s26 + $0x68] sm:$0xff] }
  0x19   : > { %376 = vmatpush1.msra.mxu0 %v250_v7  ;;  %747 = vmatpush1.msra.mxu1 %v250_v7  ;;  %v219_v42 = vld [vmem:[%s896_s26 + $0x150] sm:$0xff]  ;;  %v222_v44 = vld [vmem:[%s896_s26 + $0x168] sm:$0xff]  ;;  %v189_v45 = vld [vmem:[%s896_s26 + $0x60] sm:$0xff] }
  0x1a   : > { %377 = vmatprep.subr.mxu0 %v776_v1  ;;  %730 = vmatprep.subr.mxu1 %v776_v1  ;;  %v221_v46 = vld [vmem:[%s896_s26 + $0x160] sm:$0xff]  ;;  %v192_v47 = vld [vmem:[%s896_s26 + $0x78] sm:$0xff]  ;;  %v191_v49 = vld [vmem:[%s896_s26 + $0x70] sm:$0xff] }
  0x1b   : > { %378 = vmatpush1.msra.mxu0 %v249_v8  ;;  %748 = vmatpush1.msra.mxu1 %v249_v8  ;;  %v224_v48 = vld [vmem:[%s896_s26 + $0x178] sm:$0xff]  ;;  %v223_v50 = vld [vmem:[%s896_s26 + $0x170] sm:$0xff]  ;;  %v194_v51 = vld [vmem:[%s896_s26 + $0x88] sm:$0xff] }
  0x1c   : > { %379 = vmatprep.subr.mxu0 %v776_v1  ;;  %731 = vmatprep.subr.mxu1 %v776_v1  ;;  %v226_v52 = vld [vmem:[%s896_s26 + $0x188] sm:$0xff]  ;;  %v193_v53 = vld [vmem:[%s896_s26 + $0x80] sm:$0xff]  ;;  %v196_v55 = vld [vmem:[%s896_s26 + $0x98] sm:$0xff] }
  0x1d   : > { %380 = vmatpush1.msra.mxu0 %v248_v9  ;;  %749 = vmatpush1.msra.mxu1 %v248_v9  ;;  %v225_v54 = vld [vmem:[%s896_s26 + $0x180] sm:$0xff]  ;;  %v228_v56 = vld [vmem:[%s896_s26 + $0x198] sm:$0xff]  ;;  %v195_v57 = vld [vmem:[%s896_s26 + $0x90] sm:$0xff] }
  0x1e   : > { %381 = vmatprep.subr.mxu0 %v776_v1  ;;  %732 = vmatprep.subr.mxu1 %v776_v1  ;;  %v227_v58 = vld [vmem:[%s896_s26 + $0x190] sm:$0xff]  ;;  %v198_v59 = vld [vmem:[%s896_s26 + $0xa8] sm:$0xff]  ;;  %v197_v61 = vld [vmem:[%s896_s26 + $0xa0] sm:$0xff] }
  0x1f   : > { %382 = vmatpush1.msra.mxu0 %v247_v10  ;;  %750 = vmatpush1.msra.mxu1 %v247_v10  ;;  %v230_v60 = vld [vmem:[%s896_s26 + $0x1a8] sm:$0xff]  ;;  %v229_v62 = vld [vmem:[%s896_s26 + $0x1a0] sm:$0xff]  ;;  %v200_v63 = vld [vmem:[%s896_s26 + $0xb8] sm:$0xff] }
  0x20   : > { %383 = vmatprep.subr.mxu0 %v776_v1  ;;  %733 = vmatprep.subr.mxu1 %v776_v1  ;;  %v232_v0 = vld [vmem:[%s896_s26 + $0x1b8] sm:$0xff]  ;;  %v231_v2 = vld [vmem:[%s896_s26 + $0x1b0] sm:$0xff]  ;;  %v202_v3 = vld [vmem:[%s896_s26 + $0xc8] sm:$0xff] }
  0x21   : > { %384 = vmatpush1.msra.mxu0 %v246_v11  ;;  %751 = vmatpush1.msra.mxu1 %v246_v11  ;;  %v234_v4 = vld [vmem:[%s896_s26 + $0x1c8] sm:$0xff]  ;;  %v201_v5 = vld [vmem:[%s896_s26 + $0xc0] sm:$0xff]  ;;  %v204_v7 = vld [vmem:[%s896_s26 + $0xd8] sm:$0xff] }
  0x22   : > { %385 = vmatprep.subr.mxu0 %v776_v1  ;;  %734 = vmatprep.subr.mxu1 %v776_v1  ;;  %v233_v6 = vld [vmem:[%s896_s26 + $0x1c0] sm:$0xff]  ;;  %v236_v8 = vld [vmem:[%s896_s26 + $0x1d8] sm:$0xff]  ;;  %v203_v9 = vld [vmem:[%s896_s26 + $0xd0] sm:$0xff] }
  0x23   : > { %386 = vmatpush1.msra.mxu0 %v245_v12  ;;  %752 = vmatpush1.msra.mxu1 %v245_v12  ;;  %v235_v10 = vld [vmem:[%s896_s26 + $0x1d0] sm:$0xff]  ;;  %v206_v11 = vld [vmem:[%s896_s26 + $0xe8] sm:$0xff] }
  0x24   : > { %387 = vmatprep.subr.mxu0 %v776_v1  ;;  %735 = vmatprep.subr.mxu1 %v776_v1  ;;  %v238_v12 = vld [vmem:[%s896_s26 + $0x1e8] sm:$0xff] }
  0x25   : > { %388 = vmatpush1.msra.mxu0 %v244_v13  ;;  %753 = vmatpush1.msra.mxu1 %v244_v13  ;;  %v205_v13 = vld [vmem:[%s896_s26 + $0xe0] sm:$0xff] }
  0x26   : > { %389 = vmatprep.subr.mxu0 %v776_v1  ;;  %736 = vmatprep.subr.mxu1 %v776_v1 }
  0x27   : > { %390 = vmatpush1.msra.mxu0 %v243_v14  ;;  %754 = vmatpush1.msra.mxu1 %v243_v14  ;;  %v237_v14 = vld [vmem:[%s896_s26 + $0x1e0] sm:$0xff] }
  0x28   : > { %391 = vmatprep.subr.mxu0 %v776_v1  ;;  %737 = vmatprep.subr.mxu1 %v776_v1 }
  0x29   : > { %392 = vmatpush1.msra.mxu0 %v242_v15  ;;  %755 = vmatpush1.msra.mxu1 %v242_v15  ;;  %v208_v15 = vld [vmem:[%s896_s26 + $0xf8] sm:$0xff] }
  0x2a   : > { %393 = vmatprep.subr.mxu0 %v776_v1  ;;  %738 = vmatprep.subr.mxu1 %v776_v1 }
  0x2b   : > { %394 = vmatpush1.msra.mxu0 %v241_v16  ;;  %756 = vmatpush1.msra.mxu1 %v241_v16  ;;  %v240_v16 = vld [vmem:[%s896_s26 + $0x1f8] sm:$0xff] }
  0x2c   : > { %423 = vmatprep.subr.mxu0 %v776_v1  ;;  %739 = vmatprep.subr.mxu1 %v776_v1 }
  0x2d   : > { %424 = vmatpush2.msra.mxu0 %v258_v17  ;;  %757 = vmatpush2.msra.mxu1 %v258_v17  ;;  %v207_v17 = vld [vmem:[%s896_s26 + $0xf0] sm:$0xff] }
  0x2e   : > { %425 = vmatprep.subr.mxu0 %v776_v1  ;;  %740 = vmatprep.subr.mxu1 %v776_v1  ;;  %v199_v1 = vld [vmem:[%s896_s26 + $0xb0] sm:$0xff] }
  0x2f   : > { %426 = vmatpush2.msra.mxu0 %v257_v18  ;;  %758 = vmatpush2.msra.mxu1 %v257_v18  ;;  %v239_v18 = vld [vmem:[%s896_s26 + $0x1f0] sm:$0xff] }
  0x30   : > { %688 = vmatprep.mubr.msk.f32.mxu0 %vm266_vm0, %v178_v19  ;;  %704 = vmatprep.mubr.msk.f32.mxu1 %vm266_vm0, %v210_v20  ;;  %v1005_v19 = vld [vmem:[%s1113_s2] ss:$0 sm:$0xff] }
  0x31   : > { %428 = vmatmul.mubr.f32.vlgmr.msra.gmra.mxu0 %v177_v21  ;;  %508 = vmatmul.mubr.f32.vlgmr.msra.gmra.mxu1 %v209_v22 }
  0x32   : > { %689 = vmatprep.mubr.msk.f32.mxu0 %vm266_vm0, %v180_v23  ;;  %705 = vmatprep.mubr.msk.f32.mxu1 %vm266_vm0, %v212_v24 }
  0x35   : > { %433 = vmatmul.mubr.f32.gmra.mxu0 %v179_v25  ;;  %513 = vmatmul.mubr.f32.gmra.mxu1 %v211_v26 }
  0x36   : > { %690 = vmatprep.mubr.msk.f32.mxu0 %vm266_vm0, %v182_v27  ;;  %706 = vmatprep.mubr.msk.f32.mxu1 %vm266_vm0, %v214_v28 }
  0x39   : > { %438 = vmatmul.mubr.f32.gmra.mxu0 %v181_v29  ;;  %518 = vmatmul.mubr.f32.gmra.mxu1 %v213_v30 }
  0x3a   : > { %691 = vmatprep.mubr.msk.f32.mxu0 %vm266_vm0, %v184_v31  ;;  %707 = vmatprep.mubr.msk.f32.mxu1 %vm266_vm0, %v216_v32 }
  0x3d   : > { %443 = vmatmul.mubr.f32.gmra.mxu0 %v183_v33  ;;  %523 = vmatmul.mubr.f32.gmra.mxu1 %v215_v34 }
  0x3e   : > { %692 = vmatprep.mubr.msk.f32.mxu0 %vm266_vm0, %v186_v35  ;;  %708 = vmatprep.mubr.msk.f32.mxu1 %vm266_vm0, %v218_v36 }
  0x41   : > { %448 = vmatmul.mubr.f32.gmra.mxu0 %v185_v37  ;;  %528 = vmatmul.mubr.f32.gmra.mxu1 %v217_v38 }
  0x42   : > { %693 = vmatprep.mubr.msk.f32.mxu0 %vm266_vm0, %v188_v39  ;;  %709 = vmatprep.mubr.msk.f32.mxu1 %vm266_vm0, %v220_v40 }
  0x45   : > { %453 = vmatmul.mubr.f32.gmra.mxu0 %v187_v41  ;;  %533 = vmatmul.mubr.f32.gmra.mxu1 %v219_v42 }
  0x46   : > { %694 = vmatprep.mubr.msk.f32.mxu0 %vm266_vm0, %v190_v43  ;;  %710 = vmatprep.mubr.msk.f32.mxu1 %vm266_vm0, %v222_v44 }
  0x49   : > { %458 = vmatmul.mubr.f32.gmra.mxu0 %v189_v45  ;;  %538 = vmatmul.mubr.f32.gmra.mxu1 %v221_v46 }
  0x4a   : > { %695 = vmatprep.mubr.msk.f32.mxu0 %vm266_vm0, %v192_v47  ;;  %711 = vmatprep.mubr.msk.f32.mxu1 %vm266_vm0, %v224_v48 }
  0x4d   : > { %463 = vmatmul.mubr.f32.gmra.mxu0 %v191_v49  ;;  %543 = vmatmul.mubr.f32.gmra.mxu1 %v223_v50 }
  0x4e   : > { %696 = vmatprep.mubr.msk.f32.mxu0 %vm266_vm0, %v194_v51  ;;  %712 = vmatprep.mubr.msk.f32.mxu1 %vm266_vm0, %v226_v52 }
  0x51   : > { %468 = vmatmul.mubr.f32.gmra.mxu0 %v193_v53  ;;  %548 = vmatmul.mubr.f32.gmra.mxu1 %v225_v54 }
  0x52   : > { %697 = vmatprep.mubr.msk.f32.mxu0 %vm266_vm0, %v196_v55  ;;  %713 = vmatprep.mubr.msk.f32.mxu1 %vm266_vm0, %v228_v56 }
  0x55   : > { %473 = vmatmul.mubr.f32.gmra.mxu0 %v195_v57  ;;  %553 = vmatmul.mubr.f32.gmra.mxu1 %v227_v58 }
  0x56   : > { %698 = vmatprep.mubr.msk.f32.mxu0 %vm266_vm0, %v198_v59  ;;  %714 = vmatprep.mubr.msk.f32.mxu1 %vm266_vm0, %v230_v60 }
  0x59   : > { %478 = vmatmul.mubr.f32.gmra.mxu0 %v197_v61  ;;  %558 = vmatmul.mubr.f32.gmra.mxu1 %v229_v62 }
  0x5a   : > { %699 = vmatprep.mubr.msk.f32.mxu0 %vm266_vm0, %v200_v63  ;;  %715 = vmatprep.mubr.msk.f32.mxu1 %vm266_vm0, %v232_v0 }
  0x5d   : > { %483 = vmatmul.mubr.f32.gmra.mxu0 %v199_v1  ;;  %563 = vmatmul.mubr.f32.gmra.mxu1 %v231_v2 }
  0x5e   : > { %700 = vmatprep.mubr.msk.f32.mxu0 %vm266_vm0, %v202_v3  ;;  %716 = vmatprep.mubr.msk.f32.mxu1 %vm266_vm0, %v234_v4 }
  0x61   : > { %488 = vmatmul.mubr.f32.gmra.mxu0 %v201_v5  ;;  %568 = vmatmul.mubr.f32.gmra.mxu1 %v233_v6 }
  0x62   : > { %701 = vmatprep.mubr.msk.f32.mxu0 %vm266_vm0, %v204_v7  ;;  %717 = vmatprep.mubr.msk.f32.mxu1 %vm266_vm0, %v236_v8 }
  0x65   : > { %493 = vmatmul.mubr.f32.gmra.mxu0 %v203_v9  ;;  %573 = vmatmul.mubr.f32.gmra.mxu1 %v235_v10 }
  0x66   : > { %702 = vmatprep.mubr.msk.f32.mxu0 %vm266_vm0, %v206_v11  ;;  %718 = vmatprep.mubr.msk.f32.mxu1 %vm266_vm0, %v238_v12 }
  0x69   : > { %498 = vmatmul.mubr.f32.gmra.mxu0 %v205_v13  ;;  %578 = vmatmul.mubr.f32.gmra.mxu1 %v237_v14 }
  0x6a   : > { %703 = vmatprep.mubr.msk.f32.mxu0 %vm266_vm0, %v208_v15  ;;  %719 = vmatprep.mubr.msk.f32.mxu1 %vm266_vm0, %v240_v16 }
  0x6d   : > { %503 = vmatmul.mubr.f32.gmra.mxu0 %v207_v17  ;;  %583 = vmatmul.mubr.f32.gmra.mxu1 %v239_v18 }
  0xf1   : > { %v429_v20 = vpop.f32.mrf.mxu0  ;;  %v509_v21 = vpop.f32.mrf.mxu1 }
  0xf2   : > { %v430_v22 = vadd.f32 %v1005_v19, %v429_v20  ;;  %v510_v23 = vadd.f32 %v1005_v19, %v509_v21 }
  0xf3   : > { %v431_v24 = vpop.f32.mrf.mxu0  ;;  %v511_v25 = vpop.f32.mrf.mxu1 }
  0xf4   : > { %589 = vst.msk [vmem:[%s1010_s8] sm:$0xff] %vm588_vm1, %v430_v22  ;;  %605 = vst.msk [vmem:[%s1010_s8 + $0x80] sm:$0xff] %vm588_vm1, %v510_v23 }
  0xf5   : > { %v434_v26 = vpop.f32.mrf.mxu0  ;;  %v514_v27 = vpop.f32.mrf.mxu1 }
  0xf6   : > { %v435_v28 = vadd.f32 %v1005_v19, %v434_v26  ;;  %v515_v29 = vadd.f32 %v1005_v19, %v514_v27 }
  0xf7   : > { %v436_v30 = vpop.f32.mrf.mxu0  ;;  %v516_v31 = vpop.f32.mrf.mxu1 }
  0xf8   : > { %590 = vst.msk [vmem:[%s1010_s8 + $0x8] sm:$0xff] %vm588_vm1, %v435_v28  ;;  %606 = vst.msk [vmem:[%s1010_s8 + $0x88] sm:$0xff] %vm588_vm1, %v515_v29 }
  0xf9   : > { %v439_v32 = vpop.f32.mrf.mxu0  ;;  %v519_v33 = vpop.f32.mrf.mxu1 }
  0xfa   : > { %v440_v34 = vadd.f32 %v1005_v19, %v439_v32  ;;  %v520_v35 = vadd.f32 %v1005_v19, %v519_v33 }
  0xfb   : > { %v441_v36 = vpop.f32.mrf.mxu0  ;;  %v521_v37 = vpop.f32.mrf.mxu1 }
  0xfc   : > { %591 = vst.msk [vmem:[%s1010_s8 + $0x10] sm:$0xff] %vm588_vm1, %v440_v34  ;;  %607 = vst.msk [vmem:[%s1010_s8 + $0x90] sm:$0xff] %vm588_vm1, %v520_v35 }
  0xfd   : > { %v444_v38 = vpop.f32.mrf.mxu0  ;;  %v524_v39 = vpop.f32.mrf.mxu1 }
  0xfe   : > { %v445_v40 = vadd.f32 %v1005_v19, %v444_v38  ;;  %v525_v41 = vadd.f32 %v1005_v19, %v524_v39 }
  0xff   : > { %v446_v42 = vpop.f32.mrf.mxu0  ;;  %v526_v43 = vpop.f32.mrf.mxu1 }
 0x100   : > { %592 = vst.msk [vmem:[%s1010_s8 + $0x18] sm:$0xff] %vm588_vm1, %v445_v40  ;;  %608 = vst.msk [vmem:[%s1010_s8 + $0x98] sm:$0xff] %vm588_vm1, %v525_v41 }
 0x101   : > { %v449_v44 = vpop.f32.mrf.mxu0  ;;  %v529_v45 = vpop.f32.mrf.mxu1 }
 0x102   : > { %v450_v46 = vadd.f32 %v1005_v19, %v449_v44  ;;  %v530_v47 = vadd.f32 %v1005_v19, %v529_v45 }
 0x103   : > { %v451_v48 = vpop.f32.mrf.mxu0  ;;  %v531_v49 = vpop.f32.mrf.mxu1 }
 0x104   : > { %593 = vst.msk [vmem:[%s1010_s8 + $0x20] sm:$0xff] %vm588_vm1, %v450_v46  ;;  %609 = vst.msk [vmem:[%s1010_s8 + $0xa0] sm:$0xff] %vm588_vm1, %v530_v47 }
 0x105   : > { %v454_v50 = vpop.f32.mrf.mxu0  ;;  %v534_v51 = vpop.f32.mrf.mxu1 }
 0x106   : > { %v455_v52 = vadd.f32 %v1005_v19, %v454_v50  ;;  %v535_v53 = vadd.f32 %v1005_v19, %v534_v51 }
 0x107   : > { %v456_v54 = vpop.f32.mrf.mxu0  ;;  %v536_v55 = vpop.f32.mrf.mxu1 }
 0x108   : > { %594 = vst.msk [vmem:[%s1010_s8 + $0x28] sm:$0xff] %vm588_vm1, %v455_v52  ;;  %610 = vst.msk [vmem:[%s1010_s8 + $0xa8] sm:$0xff] %vm588_vm1, %v535_v53 }
 0x109   : > { %v459_v56 = vpop.f32.mrf.mxu0  ;;  %v539_v57 = vpop.f32.mrf.mxu1 }
 0x10a   : > { %v460_v58 = vadd.f32 %v1005_v19, %v459_v56  ;;  %v540_v59 = vadd.f32 %v1005_v19, %v539_v57 }
 0x10b   : > { %v461_v60 = vpop.f32.mrf.mxu0  ;;  %v541_v61 = vpop.f32.mrf.mxu1 }
 0x10c   : > { %595 = vst.msk [vmem:[%s1010_s8 + $0x30] sm:$0xff] %vm588_vm1, %v460_v58  ;;  %611 = vst.msk [vmem:[%s1010_s8 + $0xb0] sm:$0xff] %vm588_vm1, %v540_v59 }
 0x10d   : > { %v464_v62 = vpop.f32.mrf.mxu0  ;;  %v544_v63 = vpop.f32.mrf.mxu1 }
 0x10e   : > { %v465_v0 = vadd.f32 %v1005_v19, %v464_v62  ;;  %v545_v1 = vadd.f32 %v1005_v19, %v544_v63 }
 0x10f   : > { %v466_v2 = vpop.f32.mrf.mxu0  ;;  %v546_v3 = vpop.f32.mrf.mxu1 }
 0x110   : > { %596 = vst.msk [vmem:[%s1010_s8 + $0x38] sm:$0xff] %vm588_vm1, %v465_v0  ;;  %612 = vst.msk [vmem:[%s1010_s8 + $0xb8] sm:$0xff] %vm588_vm1, %v545_v1 }
 0x111   : > { %v469_v4 = vpop.f32.mrf.mxu0  ;;  %v549_v5 = vpop.f32.mrf.mxu1 }
 0x112   : > { %v470_v6 = vadd.f32 %v1005_v19, %v469_v4  ;;  %v550_v7 = vadd.f32 %v1005_v19, %v549_v5 }
 0x113   : > { %v471_v8 = vpop.f32.mrf.mxu0  ;;  %v551_v9 = vpop.f32.mrf.mxu1 }
 0x114   : > { %597 = vst.msk [vmem:[%s1010_s8 + $0x40] sm:$0xff] %vm588_vm1, %v470_v6  ;;  %613 = vst.msk [vmem:[%s1010_s8 + $0xc0] sm:$0xff] %vm588_vm1, %v550_v7 }
 0x115   : > { %v474_v10 = vpop.f32.mrf.mxu0  ;;  %v554_v11 = vpop.f32.mrf.mxu1 }
 0x116   : > { %v475_v12 = vadd.f32 %v1005_v19, %v474_v10  ;;  %v555_v13 = vadd.f32 %v1005_v19, %v554_v11 }
 0x117   : > { %v476_v14 = vpop.f32.mrf.mxu0  ;;  %v556_v15 = vpop.f32.mrf.mxu1 }
 0x118   : > { %598 = vst.msk [vmem:[%s1010_s8 + $0x48] sm:$0xff] %vm588_vm1, %v475_v12  ;;  %614 = vst.msk [vmem:[%s1010_s8 + $0xc8] sm:$0xff] %vm588_vm1, %v555_v13 }
 0x119   : > { %v479_v16 = vpop.f32.mrf.mxu0  ;;  %v559_v17 = vpop.f32.mrf.mxu1 }
 0x11a   : > { %v480_v18 = vadd.f32 %v1005_v19, %v479_v16  ;;  %v560_v20 = vadd.f32 %v1005_v19, %v559_v17 }
 0x11b   : > { %v481_v21 = vpop.f32.mrf.mxu0  ;;  %v561_v22 = vpop.f32.mrf.mxu1 }
 0x11c   : > { %599 = vst.msk [vmem:[%s1010_s8 + $0x50] sm:$0xff] %vm588_vm1, %v480_v18  ;;  %615 = vst.msk [vmem:[%s1010_s8 + $0xd0] sm:$0xff] %vm588_vm1, %v560_v20 }
 0x11d   : > { %v484_v23 = vpop.f32.mrf.mxu0  ;;  %v564_v24 = vpop.f32.mrf.mxu1 }
 0x11e   : > { %v485_v25 = vadd.f32 %v1005_v19, %v484_v23  ;;  %v565_v26 = vadd.f32 %v1005_v19, %v564_v24 }
 0x11f   : > { %v486_v27 = vpop.f32.mrf.mxu0  ;;  %v566_v28 = vpop.f32.mrf.mxu1 }
 0x120   : > { %600 = vst.msk [vmem:[%s1010_s8 + $0x58] sm:$0xff] %vm588_vm1, %v485_v25  ;;  %616 = vst.msk [vmem:[%s1010_s8 + $0xd8] sm:$0xff] %vm588_vm1, %v565_v26 }
 0x121   : > { %v489_v29 = vpop.f32.mrf.mxu0  ;;  %v569_v30 = vpop.f32.mrf.mxu1 }
 0x122   : > { %v490_v31 = vadd.f32 %v1005_v19, %v489_v29  ;;  %v570_v32 = vadd.f32 %v1005_v19, %v569_v30 }
 0x123   : > { %v491_v33 = vpop.f32.mrf.mxu0  ;;  %v571_v34 = vpop.f32.mrf.mxu1 }
 0x124   : > { %601 = vst.msk [vmem:[%s1010_s8 + $0x60] sm:$0xff] %vm588_vm1, %v490_v31  ;;  %617 = vst.msk [vmem:[%s1010_s8 + $0xe0] sm:$0xff] %vm588_vm1, %v570_v32 }
 0x125   : > { %v494_v35 = vpop.f32.mrf.mxu0  ;;  %v574_v36 = vpop.f32.mrf.mxu1 }
 0x126   : > { %v495_v37 = vadd.f32 %v1005_v19, %v494_v35  ;;  %v575_v38 = vadd.f32 %v1005_v19, %v574_v36 }
 0x127   : > { %v496_v39 = vpop.f32.mrf.mxu0  ;;  %v576_v40 = vpop.f32.mrf.mxu1 }
 0x128   : > { %602 = vst.msk [vmem:[%s1010_s8 + $0x68] sm:$0xff] %vm588_vm1, %v495_v37  ;;  %618 = vst.msk [vmem:[%s1010_s8 + $0xe8] sm:$0xff] %vm588_vm1, %v575_v38 }
 0x129   : > { %v499_v41 = vpop.f32.mrf.mxu0  ;;  %v579_v42 = vpop.f32.mrf.mxu1 }
 0x12a   : > { %v500_v43 = vadd.f32 %v1005_v19, %v499_v41  ;;  %v580_v44 = vadd.f32 %v1005_v19, %v579_v42 }
 0x12b   : > { %v501_v45 = vpop.f32.mrf.mxu0  ;;  %v581_v46 = vpop.f32.mrf.mxu1 }
 0x12c   : > { %603 = vst.msk [vmem:[%s1010_s8 + $0x70] sm:$0xff] %vm588_vm1, %v500_v43  ;;  %619 = vst.msk [vmem:[%s1010_s8 + $0xf0] sm:$0xff] %vm588_vm1, %v580_v44 }
 0x12d   : > { %v504_v47 = vpop.f32.mrf.mxu0  ;;  %v584_v48 = vpop.f32.mrf.mxu1 }
 0x12e   : > { %v505_v49 = vadd.f32 %v1005_v19, %v504_v47  ;;  %v585_v50 = vadd.f32 %v1005_v19, %v584_v48 }
 0x12f   : > { %v506_v51 = vpop.f32.mrf.mxu0  ;;  %v586_v52 = vpop.f32.mrf.mxu1 }
 0x130   : > { %604 = vst.msk [vmem:[%s1010_s8 + $0x78] sm:$0xff] %vm588_vm1, %v505_v49  ;;  %620 = vst.msk [vmem:[%s1010_s8 + $0xf8] sm:$0xff] %vm588_vm1, %v585_v50 }
 0x131 PF: > { %s13_s12 = sadd.s32 1, %s774_s12  }
 0x132   : > { %p10_p4 = scmp.ge.s32.totalorder %s13_s12, 4  }
 0x134   :  { %12 = sbr.rel (!%p10_p4) target bundleno = 1 (0x1), region = 62 }

// kernel: inception_a_forward.7
= control target key start
LH: loop header
LB: loop body
LE: loop exit
PB: predicated region body
PF: predicated region fallthrough
CT: control target
= control target key end

     0   :  { %s824_s12 = smov 0   ;;  %s1183_s0 = inlined_call_operand.vmem [shape: f32[512,216], index: 0, kind: input, shape index: {}]   ;;  %s1184_s1 = inlined_call_operand.vmem [shape: f32[216,24], index: 1, kind: input, shape index: {}]   ;;  %s1185_s2 = inlined_call_operand.vmem [shape: f32[1,24], index: 2, kind: input, shape index: {}]   ;;  %s1186_s3 = inlined_call_operand.vmem [shape: f32[512,24], index: 3, kind: output, shape index: {}]  }
   0x1 LB: > { %s686_s13 = sadd.s32 4294967295, %s801_s12   ;;  %p690_p0 = scmp.ge.s32.totalorder %s801_s12, 1  ;;  %s801_s12 = sphi %s824_s12, %s13_s12  }
   0x2   : > { %p139_p1 = scmp.lt.s32.totalorder %s801_s12, 3 }
   0x4   : > { %p140_p2 = pnand %p690_p0, %p139_p1 }
   0x5   : > { %s691_s27 = sshll.u32 (!%p140_p2), %s686_s13, 5 }
   0x6   : > { %143 = sbr.rel (%p140_p2) target bundleno = 323 (0x143), region = 32  ;;  %p165_p3 = scmp.lt.s32.totalorder (!%p140_p2), %s691_s27, 63 }
   0xb   : > { %v256_v0 = vld [vmem:[%s1184_s1 + $0x78] sm:$0xff]  ;;  %v803_v1 = vmov 0.0   ;;  %v255_v2 = vld [vmem:[%s1184_s1 + $0x70] sm:$0xff]  ;;  %v254_v3 = vld [vmem:[%s1184_s1 + $0x68] sm:$0xff]  ;;  %s1188_s27 = smov (!%p165_p3, %s691_s27), 63  ;;  %vm275_vm0 = vcmask 719872  }
   0xc   : > { %372 = vmatprep.subr.mxu0 %v803_v1  ;;  %732 = vmatprep.subr.mxu1 %v803_v1  ;;  %v253_v4 = vld [vmem:[%s1184_s1 + $0x60] sm:$0xff]  ;;  %v252_v5 = vld [vmem:[%s1184_s1 + $0x58] sm:$0xff]  ;;  %v251_v6 = vld [vmem:[%s1184_s1 + $0x50] sm:$0xff]  ;;  %s731_s10 = sshll.u32 %s1188_s27, 4  ;;  %s695_s22 = sshll.u32 %s1188_s27, 3  ;;  %vm597_vm1 = vcmask 195584  }
   0xd   : > { %373 = vmatpush1.msra.mxu0 %v256_v0  ;;  %759 = vmatpush1.msra.mxu1 %v256_v0  ;;  %v250_v7 = vld [vmem:[%s1184_s1 + $0x48] sm:$0xff]  ;;  %v249_v8 = vld [vmem:[%s1184_s1 + $0x40] sm:$0xff]  ;;  %v248_v9 = vld [vmem:[%s1184_s1 + $0x38] sm:$0xff]  ;;  %s968_s19 = scalar_lea.vmem %s1183_s0, %s731_s10  ;;  %s1082_s28 = scalar_lea.vmem %s1186_s3, %s695_s22 }
   0xe   : > { %374 = vmatprep.subr.mxu0 %v803_v1  ;;  %733 = vmatprep.subr.mxu1 %v803_v1  ;;  %v247_v10 = vld [vmem:[%s1184_s1 + $0x30] sm:$0xff]  ;;  %v246_v11 = vld [vmem:[%s1184_s1 + $0x28] sm:$0xff]  ;;  %v245_v12 = vld [vmem:[%s1184_s1 + $0x20] sm:$0xff] }
   0xf   : > { %375 = vmatpush1.msra.mxu0 %v255_v2  ;;  %760 = vmatpush1.msra.mxu1 %v255_v2  ;;  %v244_v13 = vld [vmem:[%s1184_s1 + $0x18] sm:$0xff]  ;;  %v243_v14 = vld [vmem:[%s1184_s1 + $0x10] sm:$0xff]  ;;  %v242_v15 = vld [vmem:[%s1184_s1 + $0x8] sm:$0xff] }
  0x10   : > { %376 = vmatprep.subr.mxu0 %v803_v1  ;;  %734 = vmatprep.subr.mxu1 %v803_v1  ;;  %v241_v16 = vld [vmem:[%s1184_s1] sm:$0xff]  ;;  %v267_v17 = vld [vmem:[%s1184_s1 + $0xd0] sm:$0xff]  ;;  %v266_v18 = vld [vmem:[%s1184_s1 + $0xc8] sm:$0xff] }
  0x11   : > { %377 = vmatpush1.msra.mxu0 %v254_v3  ;;  %761 = vmatpush1.msra.mxu1 %v254_v3  ;;  %v265_v19 = vld [vmem:[%s1184_s1 + $0xc0] sm:$0xff]  ;;  %v264_v20 = vld [vmem:[%s1184_s1 + $0xb8] sm:$0xff]  ;;  %v263_v21 = vld [vmem:[%s1184_s1 + $0xb0] sm:$0xff] }
  0x12   : > { %378 = vmatprep.subr.mxu0 %v803_v1  ;;  %735 = vmatprep.subr.mxu1 %v803_v1  ;;  %v262_v22 = vld [vmem:[%s1184_s1 + $0xa8] sm:$0xff]  ;;  %v261_v23 = vld [vmem:[%s1184_s1 + $0xa0] sm:$0xff]  ;;  %v260_v24 = vld [vmem:[%s1184_s1 + $0x98] sm:$0xff] }
  0x13   : > { %379 = vmatpush1.msra.mxu0 %v253_v4  ;;  %762 = vmatpush1.msra.mxu1 %v253_v4  ;;  %v259_v25 = vld [vmem:[%s1184_s1 + $0x90] sm:$0xff]  ;;  %v258_v26 = vld [vmem:[%s1184_s1 + $0x88] sm:$0xff]  ;;  %v257_v27 = vld [vmem:[%s1184_s1 + $0x80] sm:$0xff] }
  0x14   : > { %380 = vmatprep.subr.mxu0 %v803_v1  ;;  %736 = vmatprep.subr.mxu1 %v803_v1  ;;  %v178_v28 = vld [vmem:[%s968_s19 + $0x8] sm:$0xff]  ;;  %v177_v30 = vld [vmem:[%s968_s19] sm:$0xff]  ;;  %v180_v32 = vld [vmem:[%s968_s19 + $0x18] sm:$0xff] }
  0x15   : > { %381 = vmatpush1.msra.mxu0 %v252_v5  ;;  %763 = vmatpush1.msra.mxu1 %v252_v5  ;;  %v210_v29 = vld [vmem:[%s968_s19 + $0x108] sm:$0xff]  ;;  %v209_v31 = vld [vmem:[%s968_s19 + $0x100] sm:$0xff]  ;;  %v212_v33 = vld [vmem:[%s968_s19 + $0x118] sm:$0xff] }
  0x16   : > { %382 = vmatprep.subr.mxu0 %v803_v1  ;;  %737 = vmatprep.subr.mxu1 %v803_v1  ;;  %v179_v34 = vld [vmem:[%s968_s19 + $0x10] sm:$0xff]  ;;  %v182_v36 = vld [vmem:[%s968_s19 + $0x28] sm:$0xff]  ;;  %v181_v38 = vld [vmem:[%s968_s19 + $0x20] sm:$0xff] }
  0x17   : > { %383 = vmatpush1.msra.mxu0 %v251_v6  ;;  %764 = vmatpush1.msra.mxu1 %v251_v6  ;;  %v211_v35 = vld [vmem:[%s968_s19 + $0x110] sm:$0xff]  ;;  %v214_v37 = vld [vmem:[%s968_s19 + $0x128] sm:$0xff]  ;;  %v213_v39 = vld [vmem:[%s968_s19 + $0x120] sm:$0xff] }
  0x18   : > { %384 = vmatprep.subr.mxu0 %v803_v1  ;;  %738 = vmatprep.subr.mxu1 %v803_v1  ;;  %v184_v40 = vld [vmem:[%s968_s19 + $0x38] sm:$0xff]  ;;  %v183_v42 = vld [vmem:[%s968_s19 + $0x30] sm:$0xff]  ;;  %v186_v44 = vld [vmem:[%s968_s19 + $0x48] sm:$0xff] }
  0x19   : > { %385 = vmatpush1.msra.mxu0 %v250_v7  ;;  %765 = vmatpush1.msra.mxu1 %v250_v7  ;;  %v216_v41 = vld [vmem:[%s968_s19 + $0x138] sm:$0xff]  ;;  %v215_v43 = vld [vmem:[%s968_s19 + $0x130] sm:$0xff]  ;;  %v218_v45 = vld [vmem:[%s968_s19 + $0x148] sm:$0xff] }
  0x1a   : > { %386 = vmatprep.subr.mxu0 %v803_v1  ;;  %739 = vmatprep.subr.mxu1 %v803_v1  ;;  %v185_v46 = vld [vmem:[%s968_s19 + $0x40] sm:$0xff]  ;;  %v188_v48 = vld [vmem:[%s968_s19 + $0x58] sm:$0xff]  ;;  %v187_v50 = vld [vmem:[%s968_s19 + $0x50] sm:$0xff] }
  0x1b   : > { %387 = vmatpush1.msra.mxu0 %v249_v8  ;;  %766 = vmatpush1.msra.mxu1 %v249_v8  ;;  %v217_v47 = vld [vmem:[%s968_s19 + $0x140] sm:$0xff]  ;;  %v220_v49 = vld [vmem:[%s968_s19 + $0x158] sm:$0xff]  ;;  %v219_v51 = vld [vmem:[%s968_s19 + $0x150] sm:$0xff] }
  0x1c   : > { %388 = vmatprep.subr.mxu0 %v803_v1  ;;  %740 = vmatprep.subr.mxu1 %v803_v1  ;;  %v190_v52 = vld [vmem:[%s968_s19 + $0x68] sm:$0xff]  ;;  %v189_v54 = vld [vmem:[%s968_s19 + $0x60] sm:$0xff]  ;;  %v192_v56 = vld [vmem:[%s968_s19 + $0x78] sm:$0xff] }
  0x1d   : > { %389 = vmatpush1.msra.mxu0 %v248_v9  ;;  %767 = vmatpush1.msra.mxu1 %v248_v9  ;;  %v222_v53 = vld [vmem:[%s968_s19 + $0x168] sm:$0xff]  ;;  %v221_v55 = vld [vmem:[%s968_s19 + $0x160] sm:$0xff]  ;;  %v224_v57 = vld [vmem:[%s968_s19 + $0x178] sm:$0xff] }
  0x1e   : > { %390 = vmatprep.subr.mxu0 %v803_v1  ;;  %741 = vmatprep.subr.mxu1 %v803_v1  ;;  %v191_v58 = vld [vmem:[%s968_s19 + $0x70] sm:$0xff]  ;;  %v194_v60 = vld [vmem:[%s968_s19 + $0x88] sm:$0xff]  ;;  %v193_v62 = vld [vmem:[%s968_s19 + $0x80] sm:$0xff] }
  0x1f   : > { %391 = vmatpush1.msra.mxu0 %v247_v10  ;;  %768 = vmatpush1.msra.mxu1 %v247_v10  ;;  %v223_v59 = vld [vmem:[%s968_s19 + $0x170] sm:$0xff]  ;;  %v226_v61 = vld [vmem:[%s968_s19 + $0x188] sm:$0xff]  ;;  %v225_v63 = vld [vmem:[%s968_s19 + $0x180] sm:$0xff] }
  0x20   : > { %392 = vmatprep.subr.mxu0 %v803_v1  ;;  %742 = vmatprep.subr.mxu1 %v803_v1  ;;  %v196_v0 = vld [vmem:[%s968_s19 + $0x98] sm:$0xff]  ;;  %v195_v2 = vld [vmem:[%s968_s19 + $0x90] sm:$0xff]  ;;  %v198_v4 = vld [vmem:[%s968_s19 + $0xa8] sm:$0xff] }
  0x21   : > { %393 = vmatpush1.msra.mxu0 %v246_v11  ;;  %769 = vmatpush1.msra.mxu1 %v246_v11  ;;  %v227_v3 = vld [vmem:[%s968_s19 + $0x190] sm:$0xff]  ;;  %v230_v5 = vld [vmem:[%s968_s19 + $0x1a8] sm:$0xff]  ;;  %v197_v6 = vld [vmem:[%s968_s19 + $0xa0] sm:$0xff] }
  0x22   : > { %394 = vmatprep.subr.mxu0 %v803_v1  ;;  %743 = vmatprep.subr.mxu1 %v803_v1  ;;  %v229_v7 = vld [vmem:[%s968_s19 + $0x1a0] sm:$0xff]  ;;  %v200_v8 = vld [vmem:[%s968_s19 + $0xb8] sm:$0xff]  ;;  %v199_v10 = vld [vmem:[%s968_s19 + $0xb0] sm:$0xff] }
  0x23   : > { %395 = vmatpush1.msra.mxu0 %v245_v12  ;;  %770 = vmatpush1.msra.mxu1 %v245_v12  ;;  %v232_v9 = vld [vmem:[%s968_s19 + $0x1b8] sm:$0xff]  ;;  %v231_v11 = vld [vmem:[%s968_s19 + $0x1b0] sm:$0xff]  ;;  %v202_v12 = vld [vmem:[%s968_s19 + $0xc8] sm:$0xff] }
  0x24   : > { %396 = vmatprep.subr.mxu0 %v803_v1  ;;  %744 = vmatprep.subr.mxu1 %v803_v1 }
  0x25   : > { %397 = vmatpush1.msra.mxu0 %v244_v13  ;;  %771 = vmatpush1.msra.mxu1 %v244_v13  ;;  %v234_v13 = vld [vmem:[%s968_s19 + $0x1c8] sm:$0xff] }
  0x26   : > { %398 = vmatprep.subr.mxu0 %v803_v1  ;;  %745 = vmatprep.subr.mxu1 %v803_v1 }
  0x27   : > { %399 = vmatpush1.msra.mxu0 %v243_v14  ;;  %772 = vmatpush1.msra.mxu1 %v243_v14  ;;  %v201_v14 = vld [vmem:[%s968_s19 + $0xc0] sm:$0xff] }
  0x28   : > { %400 = vmatprep.subr.mxu0 %v803_v1  ;;  %746 = vmatprep.subr.mxu1 %v803_v1 }
  0x29   : > { %401 = vmatpush1.msra.mxu0 %v242_v15  ;;  %773 = vmatpush1.msra.mxu1 %v242_v15  ;;  %v233_v15 = vld [vmem:[%s968_s19 + $0x1c0] sm:$0xff] }
  0x2a   : > { %402 = vmatprep.subr.mxu0 %v803_v1  ;;  %747 = vmatprep.subr.mxu1 %v803_v1 }
  0x2b   : > { %403 = vmatpush1.msra.mxu0 %v241_v16  ;;  %774 = vmatpush1.msra.mxu1 %v241_v16  ;;  %v204_v16 = vld [vmem:[%s968_s19 + $0xd8] sm:$0xff] }
  0x2c   : > { %414 = vmatprep.subr.mxu0 %v803_v1  ;;  %748 = vmatprep.subr.mxu1 %v803_v1 }
  0x2d   : > { %415 = vmatpush2.msra.mxu0 %v267_v17  ;;  %775 = vmatpush2.msra.mxu1 %v267_v17  ;;  %v236_v17 = vld [vmem:[%s968_s19 + $0x1d8] sm:$0xff] }
  0x2e   : > { %416 = vmatprep.subr.mxu0 %v803_v1  ;;  %749 = vmatprep.subr.mxu1 %v803_v1 }
  0x2f   : > { %417 = vmatpush2.msra.mxu0 %v266_v18  ;;  %776 = vmatpush2.msra.mxu1 %v266_v18  ;;  %v203_v18 = vld [vmem:[%s968_s19 + $0xd0] sm:$0xff] }
  0x30   : > { %418 = vmatprep.subr.mxu0 %v803_v1  ;;  %750 = vmatprep.subr.mxu1 %v803_v1 }
  0x31   : > { %419 = vmatpush2.msra.mxu0 %v265_v19  ;;  %777 = vmatpush2.msra.mxu1 %v265_v19  ;;  %v235_v19 = vld [vmem:[%s968_s19 + $0x1d0] sm:$0xff] }
  0x32   : > { %420 = vmatprep.subr.mxu0 %v803_v1  ;;  %751 = vmatprep.subr.mxu1 %v803_v1 }
  0x33   : > { %421 = vmatpush2.msra.mxu0 %v264_v20  ;;  %778 = vmatpush2.msra.mxu1 %v264_v20  ;;  %v206_v20 = vld [vmem:[%s968_s19 + $0xe8] sm:$0xff] }
  0x34   : > { %422 = vmatprep.subr.mxu0 %v803_v1  ;;  %752 = vmatprep.subr.mxu1 %v803_v1 }
  0x35   : > { %423 = vmatpush2.msra.mxu0 %v263_v21  ;;  %779 = vmatpush2.msra.mxu1 %v263_v21  ;;  %v238_v21 = vld [vmem:[%s968_s19 + $0x1e8] sm:$0xff] }
  0x36   : > { %424 = vmatprep.subr.mxu0 %v803_v1  ;;  %753 = vmatprep.subr.mxu1 %v803_v1 }
  0x37   : > { %425 = vmatpush2.msra.mxu0 %v262_v22  ;;  %780 = vmatpush2.msra.mxu1 %v262_v22  ;;  %v205_v22 = vld [vmem:[%s968_s19 + $0xe0] sm:$0xff] }
  0x38   : > { %426 = vmatprep.subr.mxu0 %v803_v1  ;;  %754 = vmatprep.subr.mxu1 %v803_v1 }
  0x39   : > { %427 = vmatpush2.msra.mxu0 %v261_v23  ;;  %781 = vmatpush2.msra.mxu1 %v261_v23  ;;  %v237_v23 = vld [vmem:[%s968_s19 + $0x1e0] sm:$0xff] }
  0x3a   : > { %428 = vmatprep.subr.mxu0 %v803_v1  ;;  %755 = vmatprep.subr.mxu1 %v803_v1 }
  0x3b   : > { %429 = vmatpush2.msra.mxu0 %v260_v24  ;;  %782 = vmatpush2.msra.mxu1 %v260_v24  ;;  %v208_v24 = vld [vmem:[%s968_s19 + $0xf8] sm:$0xff] }
  0x3c   : > { %430 = vmatprep.subr.mxu0 %v803_v1  ;;  %756 = vmatprep.subr.mxu1 %v803_v1 }
  0x3d   : > { %431 = vmatpush2.msra.mxu0 %v259_v25  ;;  %783 = vmatpush2.msra.mxu1 %v259_v25  ;;  %v240_v25 = vld [vmem:[%s968_s19 + $0x1f8] sm:$0xff] }
  0x3e   : > { %432 = vmatprep.subr.mxu0 %v803_v1  ;;  %757 = vmatprep.subr.mxu1 %v803_v1 }
  0x3f   : > { %433 = vmatpush2.msra.mxu0 %v258_v26  ;;  %784 = vmatpush2.msra.mxu1 %v258_v26  ;;  %v207_v26 = vld [vmem:[%s968_s19 + $0xf0] sm:$0xff] }
  0x40   : > { %434 = vmatprep.subr.mxu0 %v803_v1  ;;  %758 = vmatprep.subr.mxu1 %v803_v1  ;;  %v228_v1 = vld [vmem:[%s968_s19 + $0x198] sm:$0xff] }
  0x41   : > { %435 = vmatpush2.msra.mxu0 %v257_v27  ;;  %785 = vmatpush2.msra.mxu1 %v257_v27  ;;  %v239_v27 = vld [vmem:[%s968_s19 + $0x1f0] sm:$0xff] }
  0x42   : > { %697 = vmatprep.mubr.msk.f32.mxu0 %vm275_vm0, %v178_v28  ;;  %713 = vmatprep.mubr.msk.f32.mxu1 %vm275_vm0, %v210_v29  ;;  %v1077_v28 = vld [vmem:[%s1185_s2] ss:$0 sm:$0xff] }
  0x43   : > { %437 = vmatmul.mubr.f32.vlgmr.msra.gmra.mxu0 %v177_v30  ;;  %517 = vmatmul.mubr.f32.vlgmr.msra.gmra.mxu1 %v209_v31 }
  0x44   : > { %698 = vmatprep.mubr.msk.f32.mxu0 %vm275_vm0, %v180_v32  ;;  %714 = vmatprep.mubr.msk.f32.mxu1 %vm275_vm0, %v212_v33 }
  0x47   : > { %442 = vmatmul.mubr.f32.gmra.mxu0 %v179_v34  ;;  %522 = vmatmul.mubr.f32.gmra.mxu1 %v211_v35 }
  0x48   : > { %699 = vmatprep.mubr.msk.f32.mxu0 %vm275_vm0, %v182_v36  ;;  %715 = vmatprep.mubr.msk.f32.mxu1 %vm275_vm0, %v214_v37 }
  0x4b   : > { %447 = vmatmul.mubr.f32.gmra.mxu0 %v181_v38  ;;  %527 = vmatmul.mubr.f32.gmra.mxu1 %v213_v39 }
  0x4c   : > { %700 = vmatprep.mubr.msk.f32.mxu0 %vm275_vm0, %v184_v40  ;;  %716 = vmatprep.mubr.msk.f32.mxu1 %vm275_vm0, %v216_v41 }
  0x4f   : > { %452 = vmatmul.mubr.f32.gmra.mxu0 %v183_v42  ;;  %532 = vmatmul.mubr.f32.gmra.mxu1 %v215_v43 }
  0x50   : > { %701 = vmatprep.mubr.msk.f32.mxu0 %vm275_vm0, %v186_v44  ;;  %717 = vmatprep.mubr.msk.f32.mxu1 %vm275_vm0, %v218_v45 }
  0x53   : > { %457 = vmatmul.mubr.f32.gmra.mxu0 %v185_v46  ;;  %537 = vmatmul.mubr.f32.gmra.mxu1 %v217_v47 }
  0x54   : > { %702 = vmatprep.mubr.msk.f32.mxu0 %vm275_vm0, %v188_v48  ;;  %718 = vmatprep.mubr.msk.f32.mxu1 %vm275_vm0, %v220_v49 }
  0x57   : > { %462 = vmatmul.mubr.f32.gmra.mxu0 %v187_v50  ;;  %542 = vmatmul.mubr.f32.gmra.mxu1 %v219_v51 }
  0x58   : > { %703 = vmatprep.mubr.msk.f32.mxu0 %vm275_vm0, %v190_v52  ;;  %719 = vmatprep.mubr.msk.f32.mxu1 %vm275_vm0, %v222_v53 }
  0x5b   : > { %467 = vmatmul.mubr.f32.gmra.mxu0 %v189_v54  ;;  %547 = vmatmul.mubr.f32.gmra.mxu1 %v221_v55 }
  0x5c   : > { %704 = vmatprep.mubr.msk.f32.mxu0 %vm275_vm0, %v192_v56  ;;  %720 = vmatprep.mubr.msk.f32.mxu1 %vm275_vm0, %v224_v57 }
  0x5f   : > { %472 = vmatmul.mubr.f32.gmra.mxu0 %v191_v58  ;;  %552 = vmatmul.mubr.f32.gmra.mxu1 %v223_v59 }
  0x60   : > { %705 = vmatprep.mubr.msk.f32.mxu0 %vm275_vm0, %v194_v60  ;;  %721 = vmatprep.mubr.msk.f32.mxu1 %vm275_vm0, %v226_v61 }
  0x63   : > { %477 = vmatmul.mubr.f32.gmra.mxu0 %v193_v62  ;;  %557 = vmatmul.mubr.f32.gmra.mxu1 %v225_v63 }
  0x64   : > { %706 = vmatprep.mubr.msk.f32.mxu0 %vm275_vm0, %v196_v0  ;;  %722 = vmatprep.mubr.msk.f32.mxu1 %vm275_vm0, %v228_v1 }
  0x67   : > { %482 = vmatmul.mubr.f32.gmra.mxu0 %v195_v2  ;;  %562 = vmatmul.mubr.f32.gmra.mxu1 %v227_v3 }
  0x68   : > { %707 = vmatprep.mubr.msk.f32.mxu0 %vm275_vm0, %v198_v4  ;;  %723 = vmatprep.mubr.msk.f32.mxu1 %vm275_vm0, %v230_v5 }
  0x6b   : > { %487 = vmatmul.mubr.f32.gmra.mxu0 %v197_v6  ;;  %567 = vmatmul.mubr.f32.gmra.mxu1 %v229_v7 }
  0x6c   : > { %708 = vmatprep.mubr.msk.f32.mxu0 %vm275_vm0, %v200_v8  ;;  %724 = vmatprep.mubr.msk.f32.mxu1 %vm275_vm0, %v232_v9 }
  0x6f   : > { %492 = vmatmul.mubr.f32.gmra.mxu0 %v199_v10  ;;  %572 = vmatmul.mubr.f32.gmra.mxu1 %v231_v11 }
  0x70   : > { %709 = vmatprep.mubr.msk.f32.mxu0 %vm275_vm0, %v202_v12  ;;  %725 = vmatprep.mubr.msk.f32.mxu1 %vm275_vm0, %v234_v13 }
  0x73   : > { %497 = vmatmul.mubr.f32.gmra.mxu0 %v201_v14  ;;  %577 = vmatmul.mubr.f32.gmra.mxu1 %v233_v15 }
  0x74   : > { %710 = vmatprep.mubr.msk.f32.mxu0 %vm275_vm0, %v204_v16  ;;  %726 = vmatprep.mubr.msk.f32.mxu1 %vm275_vm0, %v236_v17 }
  0x77   : > { %502 = vmatmul.mubr.f32.gmra.mxu0 %v203_v18  ;;  %582 = vmatmul.mubr.f32.gmra.mxu1 %v235_v19 }
  0x78   : > { %711 = vmatprep.mubr.msk.f32.mxu0 %vm275_vm0, %v206_v20  ;;  %727 = vmatprep.mubr.msk.f32.mxu1 %vm275_vm0, %v238_v21 }
  0x7b   : > { %507 = vmatmul.mubr.f32.gmra.mxu0 %v205_v22  ;;  %587 = vmatmul.mubr.f32.gmra.mxu1 %v237_v23 }
  0x7c   : > { %712 = vmatprep.mubr.msk.f32.mxu0 %vm275_vm0, %v208_v24  ;;  %728 = vmatprep.mubr.msk.f32.mxu1 %vm275_vm0, %v240_v25 }
  0x7f   : > { %512 = vmatmul.mubr.f32.gmra.mxu0 %v207_v26  ;;  %592 = vmatmul.mubr.f32.gmra.mxu1 %v239_v27 }
 0x103   : > { %v438_v29 = vpop.f32.mrf.mxu0  ;;  %v518_v30 = vpop.f32.mrf.mxu1 }
 0x104   : > { %v439_v31 = vadd.f32 %v1077_v28, %v438_v29  ;;  %v519_v32 = vadd.f32 %v1077_v28, %v518_v30 }
 0x105   : > { %v440_v33 = vpop.f32.mrf.mxu0  ;;  %v520_v34 = vpop.f32.mrf.mxu1 }
 0x106   : > { %598 = vst.msk [vmem:[%s1082_s28] sm:$0xff] %vm597_vm1, %v439_v31  ;;  %614 = vst.msk [vmem:[%s1082_s28 + $0x80] sm:$0xff] %vm597_vm1, %v519_v32 }
 0x107   : > { %v443_v35 = vpop.f32.mrf.mxu0  ;;  %v523_v36 = vpop.f32.mrf.mxu1 }
 0x108   : > { %v444_v37 = vadd.f32 %v1077_v28, %v443_v35  ;;  %v524_v38 = vadd.f32 %v1077_v28, %v523_v36 }
 0x109   : > { %v445_v39 = vpop.f32.mrf.mxu0  ;;  %v525_v40 = vpop.f32.mrf.mxu1 }
 0x10a   : > { %599 = vst.msk [vmem:[%s1082_s28 + $0x8] sm:$0xff] %vm597_vm1, %v444_v37  ;;  %615 = vst.msk [vmem:[%s1082_s28 + $0x88] sm:$0xff] %vm597_vm1, %v524_v38 }
 0x10b   : > { %v448_v41 = vpop.f32.mrf.mxu0  ;;  %v528_v42 = vpop.f32.mrf.mxu1 }
 0x10c   : > { %v449_v43 = vadd.f32 %v1077_v28, %v448_v41  ;;  %v529_v44 = vadd.f32 %v1077_v28, %v528_v42 }
 0x10d   : > { %v450_v45 = vpop.f32.mrf.mxu0  ;;  %v530_v46 = vpop.f32.mrf.mxu1 }
 0x10e   : > { %600 = vst.msk [vmem:[%s1082_s28 + $0x10] sm:$0xff] %vm597_vm1, %v449_v43  ;;  %616 = vst.msk [vmem:[%s1082_s28 + $0x90] sm:$0xff] %vm597_vm1, %v529_v44 }
 0x10f   : > { %v453_v47 = vpop.f32.mrf.mxu0  ;;  %v533_v48 = vpop.f32.mrf.mxu1 }
 0x110   : > { %v454_v49 = vadd.f32 %v1077_v28, %v453_v47  ;;  %v534_v50 = vadd.f32 %v1077_v28, %v533_v48 }
 0x111   : > { %v455_v51 = vpop.f32.mrf.mxu0  ;;  %v535_v52 = vpop.f32.mrf.mxu1 }
 0x112   : > { %601 = vst.msk [vmem:[%s1082_s28 + $0x18] sm:$0xff] %vm597_vm1, %v454_v49  ;;  %617 = vst.msk [vmem:[%s1082_s28 + $0x98] sm:$0xff] %vm597_vm1, %v534_v50 }
 0x113   : > { %v458_v53 = vpop.f32.mrf.mxu0  ;;  %v538_v54 = vpop.f32.mrf.mxu1 }
 0x114   : > { %v459_v55 = vadd.f32 %v1077_v28, %v458_v53  ;;  %v539_v56 = vadd.f32 %v1077_v28, %v538_v54 }
 0x115   : > { %v460_v57 = vpop.f32.mrf.mxu0  ;;  %v540_v58 = vpop.f32.mrf.mxu1 }
 0x116   : > { %602 = vst.msk [vmem:[%s1082_s28 + $0x20] sm:$0xff] %vm597_vm1, %v459_v55  ;;  %618 = vst.msk [vmem:[%s1082_s28 + $0xa0] sm:$0xff] %vm597_vm1, %v539_v56 }
 0x117   : > { %v463_v59 = vpop.f32.mrf.mxu0  ;;  %v543_v60 = vpop.f32.mrf.mxu1 }
 0x118   : > { %v464_v61 = vadd.f32 %v1077_v28, %v463_v59  ;;  %v544_v62 = vadd.f32 %v1077_v28, %v543_v60 }
 0x119   : > { %v465_v63 = vpop.f32.mrf.mxu0  ;;  %v545_v0 = vpop.f32.mrf.mxu1 }
 0x11a   : > { %603 = vst.msk [vmem:[%s1082_s28 + $0x28] sm:$0xff] %vm597_vm1, %v464_v61  ;;  %619 = vst.msk [vmem:[%s1082_s28 + $0xa8] sm:$0xff] %vm597_vm1, %v544_v62 }
 0x11b   : > { %v468_v1 = vpop.f32.mrf.mxu0  ;;  %v548_v2 = vpop.f32.mrf.mxu1 }
 0x11c   : > { %v469_v3 = vadd.f32 %v1077_v28, %v468_v1  ;;  %v549_v4 = vadd.f32 %v1077_v28, %v548_v2 }
 0x11d   : > { %v470_v5 = vpop.f32.mrf.mxu0  ;;  %v550_v6 = vpop.f32.mrf.mxu1 }
 0x11e   : > { %604 = vst.msk [vmem:[%s1082_s28 + $0x30] sm:$0xff] %vm597_vm1, %v469_v3  ;;  %620 = vst.msk [vmem:[%s1082_s28 + $0xb0] sm:$0xff] %vm597_vm1, %v549_v4 }
 0x11f   : > { %v473_v7 = vpop.f32.mrf.mxu0  ;;  %v553_v8 = vpop.f32.mrf.mxu1 }
 0x120   : > { %v474_v9 = vadd.f32 %v1077_v28, %v473_v7  ;;  %v554_v10 = vadd.f32 %v1077_v28, %v553_v8 }
 0x121   : > { %v475_v11 = vpop.f32.mrf.mxu0  ;;  %v555_v12 = vpop.f32.mrf.mxu1 }
 0x122   : > { %605 = vst.msk [vmem:[%s1082_s28 + $0x38] sm:$0xff] %vm597_vm1, %v474_v9  ;;  %621 = vst.msk [vmem:[%s1082_s28 + $0xb8] sm:$0xff] %vm597_vm1, %v554_v10 }
 0x123   : > { %v478_v13 = vpop.f32.mrf.mxu0  ;;  %v558_v14 = vpop.f32.mrf.mxu1 }
 0x124   : > { %v479_v15 = vadd.f32 %v1077_v28, %v478_v13  ;;  %v559_v16 = vadd.f32 %v1077_v28, %v558_v14 }
 0x125   : > { %v480_v17 = vpop.f32.mrf.mxu0  ;;  %v560_v18 = vpop.f32.mrf.mxu1 }
 0x126   : > { %606 = vst.msk [vmem:[%s1082_s28 + $0x40] sm:$0xff] %vm597_vm1, %v479_v15  ;;  %622 = vst.msk [vmem:[%s1082_s28 + $0xc0] sm:$0xff] %vm597_vm1, %v559_v16 }
 0x127   : > { %v483_v19 = vpop.f32.mrf.mxu0  ;;  %v563_v20 = vpop.f32.mrf.mxu1 }
 0x128   : > { %v484_v21 = vadd.f32 %v1077_v28, %v483_v19  ;;  %v564_v22 = vadd.f32 %v1077_v28, %v563_v20 }
 0x129   : > { %v485_v23 = vpop.f32.mrf.mxu0  ;;  %v565_v24 = vpop.f32.mrf.mxu1 }
 0x12a   : > { %607 = vst.msk [vmem:[%s1082_s28 + $0x48] sm:$0xff] %vm597_vm1, %v484_v21  ;;  %623 = vst.msk [vmem:[%s1082_s28 + $0xc8] sm:$0xff] %vm597_vm1, %v564_v22 }
 0x12b   : > { %v488_v25 = vpop.f32.mrf.mxu0  ;;  %v568_v26 = vpop.f32.mrf.mxu1 }
 0x12c   : > { %v489_v27 = vadd.f32 %v1077_v28, %v488_v25  ;;  %v569_v29 = vadd.f32 %v1077_v28, %v568_v26 }
 0x12d   : > { %v490_v30 = vpop.f32.mrf.mxu0  ;;  %v570_v31 = vpop.f32.mrf.mxu1 }
 0x12e   : > { %608 = vst.msk [vmem:[%s1082_s28 + $0x50] sm:$0xff] %vm597_vm1, %v489_v27  ;;  %624 = vst.msk [vmem:[%s1082_s28 + $0xd0] sm:$0xff] %vm597_vm1, %v569_v29 }
 0x12f   : > { %v493_v32 = vpop.f32.mrf.mxu0  ;;  %v573_v33 = vpop.f32.mrf.mxu1 }
 0x130   : > { %v494_v34 = vadd.f32 %v1077_v28, %v493_v32  ;;  %v574_v35 = vadd.f32 %v1077_v28, %v573_v33 }
 0x131   : > { %v495_v36 = vpop.f32.mrf.mxu0  ;;  %v575_v37 = vpop.f32.mrf.mxu1 }
 0x132   : > { %609 = vst.msk [vmem:[%s1082_s28 + $0x58] sm:$0xff] %vm597_vm1, %v494_v34  ;;  %625 = vst.msk [vmem:[%s1082_s28 + $0xd8] sm:$0xff] %vm597_vm1, %v574_v35 }
 0x133   : > { %v498_v38 = vpop.f32.mrf.mxu0  ;;  %v578_v39 = vpop.f32.mrf.mxu1 }
 0x134   : > { %v499_v40 = vadd.f32 %v1077_v28, %v498_v38  ;;  %v579_v41 = vadd.f32 %v1077_v28, %v578_v39 }
 0x135   : > { %v500_v42 = vpop.f32.mrf.mxu0  ;;  %v580_v43 = vpop.f32.mrf.mxu1 }
 0x136   : > { %610 = vst.msk [vmem:[%s1082_s28 + $0x60] sm:$0xff] %vm597_vm1, %v499_v40  ;;  %626 = vst.msk [vmem:[%s1082_s28 + $0xe0] sm:$0xff] %vm597_vm1, %v579_v41 }
 0x137   : > { %v503_v44 = vpop.f32.mrf.mxu0  ;;  %v583_v45 = vpop.f32.mrf.mxu1 }
 0x138   : > { %v504_v46 = vadd.f32 %v1077_v28, %v503_v44  ;;  %v584_v47 = vadd.f32 %v1077_v28, %v583_v45 }
 0x139   : > { %v505_v48 = vpop.f32.mrf.mxu0  ;;  %v585_v49 = vpop.f32.mrf.mxu1 }
 0x13a   : > { %611 = vst.msk [vmem:[%s1082_s28 + $0x68] sm:$0xff] %vm597_vm1, %v504_v46  ;;  %627 = vst.msk [vmem:[%s1082_s28 + $0xe8] sm:$0xff] %vm597_vm1, %v584_v47 }
 0x13b   : > { %v508_v50 = vpop.f32.mrf.mxu0  ;;  %v588_v51 = vpop.f32.mrf.mxu1 }
 0x13c   : > { %v509_v52 = vadd.f32 %v1077_v28, %v508_v50  ;;  %v589_v53 = vadd.f32 %v1077_v28, %v588_v51 }
 0x13d   : > { %v510_v54 = vpop.f32.mrf.mxu0  ;;  %v590_v55 = vpop.f32.mrf.mxu1 }
 0x13e   : > { %612 = vst.msk [vmem:[%s1082_s28 + $0x70] sm:$0xff] %vm597_vm1, %v509_v52  ;;  %628 = vst.msk [vmem:[%s1082_s28 + $0xf0] sm:$0xff] %vm597_vm1, %v589_v53 }
 0x13f   : > { %v513_v56 = vpop.f32.mrf.mxu0  ;;  %v593_v57 = vpop.f32.mrf.mxu1 }
 0x140   : > { %v514_v58 = vadd.f32 %v1077_v28, %v513_v56  ;;  %v594_v59 = vadd.f32 %v1077_v28, %v593_v57 }
 0x141   : > { %v515_v60 = vpop.f32.mrf.mxu0  ;;  %v595_v61 = vpop.f32.mrf.mxu1 }
 0x142   : > { %613 = vst.msk [vmem:[%s1082_s28 + $0x78] sm:$0xff] %vm597_vm1, %v514_v58  ;;  %629 = vst.msk [vmem:[%s1082_s28 + $0xf8] sm:$0xff] %vm597_vm1, %v594_v59 }
 0x143 PF: > { %s13_s12 = sadd.s32 1, %s801_s12  }
 0x144   : > { %p10_p4 = scmp.ge.s32.totalorder %s13_s12, 4  }
 0x146   :  { %12 = sbr.rel (!%p10_p4) target bundleno = 1 (0x1), region = 62 }

// kernel: inception_a_forward.5
= control target key start
LH: loop header
LB: loop body
LE: loop exit
PB: predicated region body
PF: predicated region fallthrough
CT: control target
= control target key end

     0   :  { %s1082_s12 = smov 0   ;;  %s1570_s0 = inlined_call_operand.vmem [shape: f32[512,400], index: 0, kind: input, shape index: {}]   ;;  %s1571_s1 = inlined_call_operand.vmem [shape: f32[400,24], index: 1, kind: input, shape index: {}]   ;;  %s1572_s2 = inlined_call_operand.vmem [shape: f32[1,24], index: 2, kind: input, shape index: {}]   ;;  %s1573_s3 = inlined_call_operand.vmem [shape: f32[512,24], index: 3, kind: output, shape index: {}]  }
   0x1 LB: > { %s998_s13 = sadd.s32 4294967295, %s1059_s12   ;;  %p1002_p0 = scmp.ge.s32.totalorder %s1059_s12, 1  ;;  %s1059_s12 = sphi %s1082_s12, %s13_s12  }
   0x2   : > { %p139_p1 = scmp.lt.s32.totalorder %s1059_s12, 3 }
   0x4   : > { %p140_p2 = pnand %p1002_p0, %p139_p1 }
   0x5   : > { %s1003_s29 = sshll.u32 (!%p140_p2), %s998_s13, 5 }
   0x6   : > { %143 = sbr.rel (%p140_p2) target bundleno = 398 (0x18e), region = 32  ;;  %p165_p3 = scmp.lt.s32.totalorder (!%p140_p2), %s1003_s29, 63 }
   0xb   : > { %v320_v0 = vld [vmem:[%s1571_s1 + $0x78] sm:$0xff]  ;;  %v1061_v1 = vmov 0.0   ;;  %v319_v2 = vld [vmem:[%s1571_s1 + $0x70] sm:$0xff]  ;;  %v318_v3 = vld [vmem:[%s1571_s1 + $0x68] sm:$0xff]  ;;  %s1575_s29 = smov (!%p165_p3, %s1003_s29), 63  ;;  %vm362_vm0 = vcmask 130048  }
   0xc   : > { %459 = vmatprep.subr.mxu0 %v1061_v1  ;;  %684 = vmatprep.subr.mxu1 %v1061_v1  ;;  %v317_v4 = vld [vmem:[%s1571_s1 + $0x60] sm:$0xff]  ;;  %v352_v5 = vld [vmem:[%s1571_s1 + $0x178] sm:$0xff]  ;;  %v351_v6 = vld [vmem:[%s1571_s1 + $0x170] sm:$0xff]  ;;  %s1043_s28 = sshll.u32 %s1575_s29, 5  ;;  %s1007_s21 = sshll.u32 %s1575_s29, 3  ;;  %vm909_vm1 = vcmask 195584  }
   0xd   : > { %460 = vmatpush1.msra.mxu0 %v320_v0  ;;  %685 = vmatpush1.msra.mxu1 %v352_v5  ;;  %v316_v7 = vld [vmem:[%s1571_s1 + $0x58] sm:$0xff]  ;;  %v350_v8 = vld [vmem:[%s1571_s1 + $0x168] sm:$0xff]  ;;  %v315_v9 = vld [vmem:[%s1571_s1 + $0x50] sm:$0xff]  ;;  %s1232_s13 = scalar_lea.vmem %s1570_s0, %s1043_s28  ;;  %s1470_s23 = scalar_lea.vmem %s1573_s3, %s1007_s21 }
   0xe   : > { %461 = vmatprep.subr.mxu0 %v1061_v1  ;;  %686 = vmatprep.subr.mxu1 %v1061_v1  ;;  %v349_v10 = vld [vmem:[%s1571_s1 + $0x160] sm:$0xff]  ;;  %v314_v11 = vld [vmem:[%s1571_s1 + $0x48] sm:$0xff]  ;;  %v348_v12 = vld [vmem:[%s1571_s1 + $0x158] sm:$0xff] }
   0xf   : > { %462 = vmatpush1.msra.mxu0 %v319_v2  ;;  %687 = vmatpush1.msra.mxu1 %v351_v6  ;;  %v313_v13 = vld [vmem:[%s1571_s1 + $0x40] sm:$0xff]  ;;  %v347_v14 = vld [vmem:[%s1571_s1 + $0x150] sm:$0xff]  ;;  %v312_v15 = vld [vmem:[%s1571_s1 + $0x38] sm:$0xff] }
  0x10   : > { %463 = vmatprep.subr.mxu0 %v1061_v1  ;;  %688 = vmatprep.subr.mxu1 %v1061_v1  ;;  %v346_v16 = vld [vmem:[%s1571_s1 + $0x148] sm:$0xff]  ;;  %v311_v17 = vld [vmem:[%s1571_s1 + $0x30] sm:$0xff]  ;;  %v345_v18 = vld [vmem:[%s1571_s1 + $0x140] sm:$0xff] }
  0x11   : > { %464 = vmatpush1.msra.mxu0 %v318_v3  ;;  %689 = vmatpush1.msra.mxu1 %v350_v8  ;;  %v310_v19 = vld [vmem:[%s1571_s1 + $0x28] sm:$0xff]  ;;  %v344_v20 = vld [vmem:[%s1571_s1 + $0x138] sm:$0xff]  ;;  %v309_v21 = vld [vmem:[%s1571_s1 + $0x20] sm:$0xff] }
  0x12   : > { %465 = vmatprep.subr.mxu0 %v1061_v1  ;;  %690 = vmatprep.subr.mxu1 %v1061_v1  ;;  %v343_v22 = vld [vmem:[%s1571_s1 + $0x130] sm:$0xff]  ;;  %v308_v23 = vld [vmem:[%s1571_s1 + $0x18] sm:$0xff]  ;;  %v342_v24 = vld [vmem:[%s1571_s1 + $0x128] sm:$0xff] }
  0x13   : > { %466 = vmatpush1.msra.mxu0 %v317_v4  ;;  %691 = vmatpush1.msra.mxu1 %v349_v10  ;;  %v307_v25 = vld [vmem:[%s1571_s1 + $0x10] sm:$0xff]  ;;  %v341_v26 = vld [vmem:[%s1571_s1 + $0x120] sm:$0xff]  ;;  %v306_v27 = vld [vmem:[%s1571_s1 + $0x8] sm:$0xff] }
  0x14   : > { %467 = vmatprep.subr.mxu0 %v1061_v1  ;;  %692 = vmatprep.subr.mxu1 %v1061_v1  ;;  %v340_v28 = vld [vmem:[%s1571_s1 + $0x118] sm:$0xff]  ;;  %v305_v29 = vld [vmem:[%s1571_s1] sm:$0xff]  ;;  %v339_v30 = vld [vmem:[%s1571_s1 + $0x110] sm:$0xff] }
  0x15   : > { %468 = vmatpush1.msra.mxu0 %v316_v7  ;;  %693 = vmatpush1.msra.mxu1 %v348_v12  ;;  %v336_v31 = vld [vmem:[%s1571_s1 + $0xf8] sm:$0xff]  ;;  %v338_v32 = vld [vmem:[%s1571_s1 + $0x108] sm:$0xff]  ;;  %v335_v33 = vld [vmem:[%s1571_s1 + $0xf0] sm:$0xff] }
  0x16   : > { %469 = vmatprep.subr.mxu0 %v1061_v1  ;;  %694 = vmatprep.subr.mxu1 %v1061_v1  ;;  %v337_v34 = vld [vmem:[%s1571_s1 + $0x100] sm:$0xff]  ;;  %v334_v35 = vld [vmem:[%s1571_s1 + $0xe8] sm:$0xff]  ;;  %v332_v40 = vld [vmem:[%s1571_s1 + $0xd8] sm:$0xff] }
  0x17   : > { %470 = vmatpush1.msra.mxu0 %v315_v9  ;;  %695 = vmatpush1.msra.mxu1 %v347_v14  ;;  %v354_v36 = vld [vmem:[%s1571_s1 + $0x188] sm:$0xff]  ;;  %v333_v37 = vld [vmem:[%s1571_s1 + $0xe0] sm:$0xff]  ;;  %v180_v41 = vld [vmem:[%s1232_s13 + $0x18] sm:$0xff] }
  0x18   : > { %471 = vmatprep.subr.mxu0 %v1061_v1  ;;  %696 = vmatprep.subr.mxu1 %v1061_v1  ;;  %v178_v38 = vld [vmem:[%s1232_s13 + $0x8] sm:$0xff]  ;;  %v353_v39 = vld [vmem:[%s1571_s1 + $0x180] sm:$0xff]  ;;  %v179_v42 = vld [vmem:[%s1232_s13 + $0x10] sm:$0xff] }
  0x19   : > { %472 = vmatpush1.msra.mxu0 %v314_v11  ;;  %697 = vmatpush1.msra.mxu1 %v346_v16  ;;  %v331_v43 = vld [vmem:[%s1571_s1 + $0xd0] sm:$0xff]  ;;  %v184_v44 = vld [vmem:[%s1232_s13 + $0x38] sm:$0xff]  ;;  %v330_v45 = vld [vmem:[%s1571_s1 + $0xc8] sm:$0xff] }
  0x1a   : > { %473 = vmatprep.subr.mxu0 %v1061_v1  ;;  %698 = vmatprep.subr.mxu1 %v1061_v1  ;;  %v183_v46 = vld [vmem:[%s1232_s13 + $0x30] sm:$0xff]  ;;  %v329_v47 = vld [vmem:[%s1571_s1 + $0xc0] sm:$0xff]  ;;  %v188_v48 = vld [vmem:[%s1232_s13 + $0x58] sm:$0xff] }
  0x1b   : > { %474 = vmatpush1.msra.mxu0 %v313_v13  ;;  %699 = vmatpush1.msra.mxu1 %v345_v18  ;;  %v328_v49 = vld [vmem:[%s1571_s1 + $0xb8] sm:$0xff]  ;;  %v187_v50 = vld [vmem:[%s1232_s13 + $0x50] sm:$0xff]  ;;  %v326_v53 = vld [vmem:[%s1571_s1 + $0xa8] sm:$0xff] }
  0x1c   : > { %475 = vmatprep.subr.mxu0 %v1061_v1  ;;  %700 = vmatprep.subr.mxu1 %v1061_v1  ;;  %v327_v51 = vld [vmem:[%s1571_s1 + $0xb0] sm:$0xff]  ;;  %v192_v52 = vld [vmem:[%s1232_s13 + $0x78] sm:$0xff]  ;;  %v325_v55 = vld [vmem:[%s1571_s1 + $0xa0] sm:$0xff] }
  0x1d   : > { %476 = vmatpush1.msra.mxu0 %v312_v15  ;;  %701 = vmatpush1.msra.mxu1 %v344_v20  ;;  %v191_v54 = vld [vmem:[%s1232_s13 + $0x70] sm:$0xff]  ;;  %v196_v56 = vld [vmem:[%s1232_s13 + $0x98] sm:$0xff]  ;;  %v322_v61 = vld [vmem:[%s1571_s1 + $0x88] sm:$0xff] }
  0x1e   : > { %477 = vmatprep.subr.mxu0 %v1061_v1  ;;  %702 = vmatprep.subr.mxu1 %v1061_v1  ;;  %v324_v57 = vld [vmem:[%s1571_s1 + $0x98] sm:$0xff]  ;;  %v195_v58 = vld [vmem:[%s1232_s13 + $0x90] sm:$0xff]  ;;  %v321_v63 = vld [vmem:[%s1571_s1 + $0x80] sm:$0xff] }
  0x1f   : > { %478 = vmatpush1.msra.mxu0 %v311_v17  ;;  %703 = vmatpush1.msra.mxu1 %v343_v22  ;;  %v323_v59 = vld [vmem:[%s1571_s1 + $0x90] sm:$0xff]  ;;  %v200_v60 = vld [vmem:[%s1232_s13 + $0xb8] sm:$0xff]  ;;  %v177_v2 = vld [vmem:[%s1232_s13] sm:$0xff] }
  0x20   : > { %479 = vmatprep.subr.mxu0 %v1061_v1  ;;  %704 = vmatprep.subr.mxu1 %v1061_v1  ;;  %v199_v62 = vld [vmem:[%s1232_s13 + $0xb0] sm:$0xff]  ;;  %v204_v0 = vld [vmem:[%s1232_s13 + $0xd8] sm:$0xff]  ;;  %v182_v3 = vld [vmem:[%s1232_s13 + $0x28] sm:$0xff] }
  0x21   : > { %480 = vmatpush1.msra.mxu0 %v310_v19  ;;  %705 = vmatpush1.msra.mxu1 %v342_v24  ;;  %v203_v4 = vld [vmem:[%s1232_s13 + $0xd0] sm:$0xff]  ;;  %v208_v5 = vld [vmem:[%s1232_s13 + $0xf8] sm:$0xff]  ;;  %v181_v6 = vld [vmem:[%s1232_s13 + $0x20] sm:$0xff] }
  0x22   : > { %481 = vmatprep.subr.mxu0 %v1061_v1  ;;  %706 = vmatprep.subr.mxu1 %v1061_v1  ;;  %v186_v7 = vld [vmem:[%s1232_s13 + $0x48] sm:$0xff]  ;;  %v212_v8 = vld [vmem:[%s1232_s13 + $0x118] sm:$0xff]  ;;  %v185_v9 = vld [vmem:[%s1232_s13 + $0x40] sm:$0xff] }
  0x23   : > { %482 = vmatpush1.msra.mxu0 %v309_v21  ;;  %707 = vmatpush1.msra.mxu1 %v341_v26  ;;  %v190_v10 = vld [vmem:[%s1232_s13 + $0x68] sm:$0xff]  ;;  %v211_v11 = vld [vmem:[%s1232_s13 + $0x110] sm:$0xff]  ;;  %v216_v12 = vld [vmem:[%s1232_s13 + $0x138] sm:$0xff] }
  0x24   : > { %483 = vmatprep.subr.mxu0 %v1061_v1  ;;  %708 = vmatprep.subr.mxu1 %v1061_v1  ;;  %v189_v13 = vld [vmem:[%s1232_s13 + $0x60] sm:$0xff]  ;;  %v194_v14 = vld [vmem:[%s1232_s13 + $0x88] sm:$0xff]  ;;  %v215_v15 = vld [vmem:[%s1232_s13 + $0x130] sm:$0xff] }
  0x25   : > { %484 = vmatpush1.msra.mxu0 %v308_v23  ;;  %709 = vmatpush1.msra.mxu1 %v340_v28  ;;  %v220_v16 = vld [vmem:[%s1232_s13 + $0x158] sm:$0xff]  ;;  %v193_v17 = vld [vmem:[%s1232_s13 + $0x80] sm:$0xff]  ;;  %v198_v18 = vld [vmem:[%s1232_s13 + $0xa8] sm:$0xff] }
  0x26   : > { %485 = vmatprep.subr.mxu0 %v1061_v1  ;;  %710 = vmatprep.subr.mxu1 %v1061_v1  ;;  %v219_v19 = vld [vmem:[%s1232_s13 + $0x150] sm:$0xff]  ;;  %v224_v20 = vld [vmem:[%s1232_s13 + $0x178] sm:$0xff]  ;;  %v197_v21 = vld [vmem:[%s1232_s13 + $0xa0] sm:$0xff] }
  0x27   : > { %486 = vmatpush1.msra.mxu0 %v307_v25  ;;  %711 = vmatpush1.msra.mxu1 %v339_v30  ;;  %v202_v22 = vld [vmem:[%s1232_s13 + $0xc8] sm:$0xff]  ;;  %v223_v23 = vld [vmem:[%s1232_s13 + $0x170] sm:$0xff]  ;;  %v228_v24 = vld [vmem:[%s1232_s13 + $0x198] sm:$0xff] }
  0x28   : > { %487 = vmatprep.subr.mxu0 %v1061_v1  ;;  %712 = vmatprep.subr.mxu1 %v1061_v1  ;;  %v201_v25 = vld [vmem:[%s1232_s13 + $0xc0] sm:$0xff]  ;;  %v206_v26 = vld [vmem:[%s1232_s13 + $0xe8] sm:$0xff]  ;;  %v232_v28 = vld [vmem:[%s1232_s13 + $0x1b8] sm:$0xff] }
  0x29   : > { %488 = vmatpush1.msra.mxu0 %v306_v27  ;;  %713 = vmatpush1.msra.mxu1 %v338_v32  ;;  %v227_v27 = vld [vmem:[%s1232_s13 + $0x190] sm:$0xff]  ;;  %v210_v30 = vld [vmem:[%s1232_s13 + $0x108] sm:$0xff]  ;;  %v236_v32 = vld [vmem:[%s1232_s13 + $0x1d8] sm:$0xff] }
  0x2a   : > { %489 = vmatprep.subr.mxu0 %v1061_v1  ;;  %714 = vmatprep.subr.mxu1 %v1061_v1 }
  0x2b   : > { %490 = vmatpush1.msra.mxu0 %v305_v29  ;;  %715 = vmatpush1.msra.mxu1 %v337_v34  ;;  %v205_v29 = vld [vmem:[%s1232_s13 + $0xe0] sm:$0xff]  ;;  %v214_v34 = vld [vmem:[%s1232_s13 + $0x128] sm:$0xff] }
  0x2c   : > { %491 = vmatprep.subr.mxu0 %v1061_v1  ;;  %744 = vmatprep.subr.mxu1 %v1061_v1 }
  0x2d   : > { %492 = vmatpush2.msra.mxu0 %v336_v31  ;;  %745 = vmatpush2.msra.mxu1 %v354_v36  ;;  %v231_v31 = vld [vmem:[%s1232_s13 + $0x1b0] sm:$0xff]  ;;  %v240_v36 = vld [vmem:[%s1232_s13 + $0x1f8] sm:$0xff] }
  0x2e   : > { %493 = vmatprep.subr.mxu0 %v1061_v1  ;;  %746 = vmatprep.subr.mxu1 %v1061_v1 }
  0x2f   : > { %494 = vmatpush2.msra.mxu0 %v335_v33  ;;  %523 = vmatprep.mubr.f32.mxu0 %v178_v38  ;;  %v209_v33 = vld [vmem:[%s1232_s13 + $0x100] sm:$0xff]  ;;  %v218_v38 = vld [vmem:[%s1232_s13 + $0x148] sm:$0xff] }
  0x30   : > { %495 = vmatprep.subr.mxu0 %v1061_v1  ;;  %747 = vmatpush2.msra.mxu1 %v353_v39  ;;  %v239_v39 = vld [vmem:[%s1232_s13 + $0x1f0] sm:$0xff] }
  0x31   : > { %496 = vmatpush2.msra.mxu0 %v334_v35  ;;  %1009 = vmatprep.mubr.msk.f32.mxu1 %vm362_vm0, %v180_v41  ;;  %v235_v35 = vld [vmem:[%s1232_s13 + $0x1d0] sm:$0xff]  ;;  %v217_v41 = vld [vmem:[%s1232_s13 + $0x140] sm:$0xff] }
  0x32   : > { %497 = vmatprep.subr.mxu0 %v1061_v1  ;;  %749 = vmatmul.mubr.f32.vlgmr.msra.gmra.mxu1 %v179_v42  ;;  %v222_v42 = vld [vmem:[%s1232_s13 + $0x168] sm:$0xff] }
  0x33   : > { %498 = vmatpush2.msra.mxu0 %v333_v37  ;;  %1010 = vmatprep.mubr.msk.f32.mxu1 %vm362_vm0, %v184_v44  ;;  %v213_v37 = vld [vmem:[%s1232_s13 + $0x120] sm:$0xff]  ;;  %v248_v44 = vld [vmem:[%s1232_s13 + $0x238] sm:$0xff] }
  0x34   : > { %499 = vmatprep.subr.mxu0 %v1061_v1 }
  0x35   : > { %500 = vmatpush2.msra.mxu0 %v332_v40  ;;  %v244_v40 = vld [vmem:[%s1232_s13 + $0x218] sm:$0xff] }
  0x36   : > { %501 = vmatprep.subr.mxu0 %v1061_v1  ;;  %754 = vmatmul.mubr.f32.gmra.mxu1 %v183_v46  ;;  %v226_v46 = vld [vmem:[%s1232_s13 + $0x188] sm:$0xff] }
  0x37   : > { %502 = vmatpush2.msra.mxu0 %v331_v43  ;;  %1011 = vmatprep.mubr.msk.f32.mxu1 %vm362_vm0, %v188_v48  ;;  %v243_v43 = vld [vmem:[%s1232_s13 + $0x210] sm:$0xff]  ;;  %v252_v48 = vld [vmem:[%s1232_s13 + $0x258] sm:$0xff] }
  0x38   : > { %503 = vmatprep.subr.mxu0 %v1061_v1 }
  0x39   : > { %504 = vmatpush2.msra.mxu0 %v330_v45  ;;  %v221_v45 = vld [vmem:[%s1232_s13 + $0x160] sm:$0xff] }
  0x3a   : > { %505 = vmatprep.subr.mxu0 %v1061_v1  ;;  %759 = vmatmul.mubr.f32.gmra.mxu1 %v187_v50  ;;  %v230_v50 = vld [vmem:[%s1232_s13 + $0x1a8] sm:$0xff] }
  0x3b   : > { %506 = vmatpush2.msra.mxu0 %v329_v47  ;;  %1012 = vmatprep.mubr.msk.f32.mxu1 %vm362_vm0, %v192_v52  ;;  %v247_v47 = vld [vmem:[%s1232_s13 + $0x230] sm:$0xff]  ;;  %v256_v52 = vld [vmem:[%s1232_s13 + $0x278] sm:$0xff] }
  0x3c   : > { %507 = vmatprep.subr.mxu0 %v1061_v1 }
  0x3d   : > { %508 = vmatpush2.msra.mxu0 %v328_v49  ;;  %v225_v49 = vld [vmem:[%s1232_s13 + $0x180] sm:$0xff] }
  0x3e   : > { %509 = vmatprep.subr.mxu0 %v1061_v1  ;;  %764 = vmatmul.mubr.f32.gmra.mxu1 %v191_v54  ;;  %v234_v54 = vld [vmem:[%s1232_s13 + $0x1c8] sm:$0xff] }
  0x3f   : > { %510 = vmatpush2.msra.mxu0 %v327_v51  ;;  %1013 = vmatprep.mubr.msk.f32.mxu1 %vm362_vm0, %v196_v56  ;;  %v251_v51 = vld [vmem:[%s1232_s13 + $0x250] sm:$0xff]  ;;  %v260_v56 = vld [vmem:[%s1232_s13 + $0x298] sm:$0xff] }
  0x40   : > { %511 = vmatprep.subr.mxu0 %v1061_v1 }
  0x41   : > { %512 = vmatpush2.msra.mxu0 %v326_v53  ;;  %v229_v53 = vld [vmem:[%s1232_s13 + $0x1a0] sm:$0xff] }
  0x42   : > { %513 = vmatprep.subr.mxu0 %v1061_v1  ;;  %769 = vmatmul.mubr.f32.gmra.mxu1 %v195_v58  ;;  %v238_v58 = vld [vmem:[%s1232_s13 + $0x1e8] sm:$0xff] }
  0x43   : > { %514 = vmatpush2.msra.mxu0 %v325_v55  ;;  %1014 = vmatprep.mubr.msk.f32.mxu1 %vm362_vm0, %v200_v60  ;;  %v255_v55 = vld [vmem:[%s1232_s13 + $0x270] sm:$0xff]  ;;  %v264_v60 = vld [vmem:[%s1232_s13 + $0x2b8] sm:$0xff] }
  0x44   : > { %515 = vmatprep.subr.mxu0 %v1061_v1 }
  0x45   : > { %516 = vmatpush2.msra.mxu0 %v324_v57  ;;  %v233_v57 = vld [vmem:[%s1232_s13 + $0x1c0] sm:$0xff] }
  0x46   : > { %517 = vmatprep.subr.mxu0 %v1061_v1  ;;  %774 = vmatmul.mubr.f32.gmra.mxu1 %v199_v62  ;;  %v242_v62 = vld [vmem:[%s1232_s13 + $0x208] sm:$0xff] }
  0x47   : > { %518 = vmatpush2.msra.mxu0 %v323_v59  ;;  %1015 = vmatprep.mubr.msk.f32.mxu1 %vm362_vm0, %v204_v0  ;;  %v259_v59 = vld [vmem:[%s1232_s13 + $0x290] sm:$0xff]  ;;  %v268_v0 = vld [vmem:[%s1232_s13 + $0x2d8] sm:$0xff] }
  0x48   : > { %519 = vmatprep.subr.mxu0 %v1061_v1 }
  0x49   : > { %520 = vmatpush2.msra.mxu0 %v322_v61  ;;  %v237_v61 = vld [vmem:[%s1232_s13 + $0x1e0] sm:$0xff] }
  0x4a   : > { %521 = vmatprep.subr.mxu0 %v1061_v1  ;;  %779 = vmatmul.mubr.f32.gmra.mxu1 %v203_v4  ;;  %v207_v1 = vld [vmem:[%s1232_s13 + $0xf0] sm:$0xff] }
  0x4b   : > { %522 = vmatpush2.msra.mxu0 %v321_v63  ;;  %1016 = vmatprep.mubr.msk.f32.mxu1 %vm362_vm0, %v208_v5  ;;  %v263_v63 = vld [vmem:[%s1232_s13 + $0x2b0] sm:$0xff]  ;;  %v272_v5 = vld [vmem:[%s1232_s13 + $0x2f8] sm:$0xff] }
  0x4c   : > { %524 = vmatmul.mubr.f32.vlgmr.msra.gmra.mxu0 %v177_v2  ;;  %v241_v2 = vld [vmem:[%s1232_s13 + $0x200] sm:$0xff]  ;;  %v267_v4 = vld [vmem:[%s1232_s13 + $0x2d0] sm:$0xff] }
  0x4d   : > { %528 = vmatprep.mubr.f32.mxu0 %v182_v3  ;;  %v246_v3 = vld [vmem:[%s1232_s13 + $0x228] sm:$0xff] }
  0x4e   : > { %784 = vmatmul.mubr.f32.gmra.mxu1 %v207_v1  ;;  %v271_v1 = vld [vmem:[%s1232_s13 + $0x2f0] sm:$0xff] }
  0x4f   : > { %1017 = vmatprep.mubr.msk.f32.mxu1 %vm362_vm0, %v212_v8  ;;  %v276_v8 = vld [vmem:[%s1232_s13 + $0x318] sm:$0xff] }
  0x50   : > { %529 = vmatmul.mubr.f32.gmra.mxu0 %v181_v6  ;;  %v245_v6 = vld [vmem:[%s1232_s13 + $0x220] sm:$0xff] }
  0x51   : > { %533 = vmatprep.mubr.f32.mxu0 %v186_v7  ;;  %v250_v7 = vld [vmem:[%s1232_s13 + $0x248] sm:$0xff] }
  0x52   : > { %789 = vmatmul.mubr.f32.gmra.mxu1 %v211_v11  ;;  %v275_v11 = vld [vmem:[%s1232_s13 + $0x310] sm:$0xff] }
  0x53   : > { %1018 = vmatprep.mubr.msk.f32.mxu1 %vm362_vm0, %v216_v12  ;;  %v280_v12 = vld [vmem:[%s1232_s13 + $0x338] sm:$0xff] }
  0x54   : > { %534 = vmatmul.mubr.f32.gmra.mxu0 %v185_v9  ;;  %v249_v9 = vld [vmem:[%s1232_s13 + $0x240] sm:$0xff] }
  0x55   : > { %538 = vmatprep.mubr.f32.mxu0 %v190_v10  ;;  %v254_v10 = vld [vmem:[%s1232_s13 + $0x268] sm:$0xff] }
  0x56   : > { %794 = vmatmul.mubr.f32.gmra.mxu1 %v215_v15  ;;  %v279_v15 = vld [vmem:[%s1232_s13 + $0x330] sm:$0xff] }
  0x57   : > { %1019 = vmatprep.mubr.msk.f32.mxu1 %vm362_vm0, %v220_v16  ;;  %v284_v16 = vld [vmem:[%s1232_s13 + $0x358] sm:$0xff] }
  0x58   : > { %539 = vmatmul.mubr.f32.gmra.mxu0 %v189_v13  ;;  %v253_v13 = vld [vmem:[%s1232_s13 + $0x260] sm:$0xff] }
  0x59   : > { %543 = vmatprep.mubr.f32.mxu0 %v194_v14  ;;  %v258_v14 = vld [vmem:[%s1232_s13 + $0x288] sm:$0xff] }
  0x5a   : > { %799 = vmatmul.mubr.f32.gmra.mxu1 %v219_v19  ;;  %v283_v19 = vld [vmem:[%s1232_s13 + $0x350] sm:$0xff] }
  0x5b   : > { %1020 = vmatprep.mubr.msk.f32.mxu1 %vm362_vm0, %v224_v20  ;;  %v288_v20 = vld [vmem:[%s1232_s13 + $0x378] sm:$0xff] }
  0x5c   : > { %544 = vmatmul.mubr.f32.gmra.mxu0 %v193_v17  ;;  %v257_v17 = vld [vmem:[%s1232_s13 + $0x280] sm:$0xff] }
  0x5d   : > { %548 = vmatprep.mubr.f32.mxu0 %v198_v18  ;;  %v262_v18 = vld [vmem:[%s1232_s13 + $0x2a8] sm:$0xff] }
  0x5e   : > { %804 = vmatmul.mubr.f32.gmra.mxu1 %v223_v23  ;;  %v287_v23 = vld [vmem:[%s1232_s13 + $0x370] sm:$0xff] }
  0x5f   : > { %1021 = vmatprep.mubr.msk.f32.mxu1 %vm362_vm0, %v228_v24  ;;  %v292_v24 = vld [vmem:[%s1232_s13 + $0x398] sm:$0xff] }
  0x60   : > { %549 = vmatmul.mubr.f32.gmra.mxu0 %v197_v21  ;;  %v261_v21 = vld [vmem:[%s1232_s13 + $0x2a0] sm:$0xff] }
  0x61   : > { %553 = vmatprep.mubr.f32.mxu0 %v202_v22  ;;  %v266_v22 = vld [vmem:[%s1232_s13 + $0x2c8] sm:$0xff] }
  0x62   : > { %809 = vmatmul.mubr.f32.gmra.mxu1 %v227_v27  ;;  %v291_v27 = vld [vmem:[%s1232_s13 + $0x390] sm:$0xff] }
  0x63   : > { %1022 = vmatprep.mubr.msk.f32.mxu1 %vm362_vm0, %v232_v28  ;;  %v296_v28 = vld [vmem:[%s1232_s13 + $0x3b8] sm:$0xff] }
  0x64   : > { %554 = vmatmul.mubr.f32.gmra.mxu0 %v201_v25  ;;  %v265_v25 = vld [vmem:[%s1232_s13 + $0x2c0] sm:$0xff] }
  0x65   : > { %558 = vmatprep.mubr.f32.mxu0 %v206_v26  ;;  %v270_v26 = vld [vmem:[%s1232_s13 + $0x2e8] sm:$0xff] }
  0x66   : > { %814 = vmatmul.mubr.f32.gmra.mxu1 %v231_v31  ;;  %v295_v31 = vld [vmem:[%s1232_s13 + $0x3b0] sm:$0xff] }
  0x67   : > { %1023 = vmatprep.mubr.msk.f32.mxu1 %vm362_vm0, %v236_v32  ;;  %v300_v32 = vld [vmem:[%s1232_s13 + $0x3d8] sm:$0xff] }
  0x68   : > { %559 = vmatmul.mubr.f32.gmra.mxu0 %v205_v29  ;;  %v269_v29 = vld [vmem:[%s1232_s13 + $0x2e0] sm:$0xff] }
  0x69   : > { %563 = vmatprep.mubr.f32.mxu0 %v210_v30  ;;  %v274_v30 = vld [vmem:[%s1232_s13 + $0x308] sm:$0xff] }
  0x6a   : > { %819 = vmatmul.mubr.f32.gmra.mxu1 %v235_v35  ;;  %v299_v35 = vld [vmem:[%s1232_s13 + $0x3d0] sm:$0xff] }
  0x6b   : > { %1024 = vmatprep.mubr.msk.f32.mxu1 %vm362_vm0, %v240_v36  ;;  %v304_v36 = vld [vmem:[%s1232_s13 + $0x3f8] sm:$0xff] }
  0x6c   : > { %564 = vmatmul.mubr.f32.gmra.mxu0 %v209_v33  ;;  %v273_v33 = vld [vmem:[%s1232_s13 + $0x300] sm:$0xff] }
  0x6d   : > { %568 = vmatprep.mubr.f32.mxu0 %v214_v34  ;;  %v278_v34 = vld [vmem:[%s1232_s13 + $0x328] sm:$0xff] }
  0x6e   : > { %824 = vmatmul.mubr.f32.gmra.mxu1 %v239_v39  ;;  %v303_v39 = vld [vmem:[%s1232_s13 + $0x3f0] sm:$0xff] }
  0x6f   : > { %1025 = vmatprep.mubr.msk.f32.mxu1 %vm362_vm0, %v244_v40  ;;  %v281_v40 = vld [vmem:[%s1232_s13 + $0x340] sm:$0xff] }
  0x70   : > { %569 = vmatmul.mubr.f32.gmra.mxu0 %v213_v37  ;;  %v277_v37 = vld [vmem:[%s1232_s13 + $0x320] sm:$0xff] }
  0x71   : > { %573 = vmatprep.mubr.f32.mxu0 %v218_v38  ;;  %v282_v38 = vld [vmem:[%s1232_s13 + $0x348] sm:$0xff] }
  0x72   : > { %829 = vmatmul.mubr.f32.gmra.mxu1 %v243_v43  ;;  %v290_v43 = vld [vmem:[%s1232_s13 + $0x388] sm:$0xff] }
  0x73   : > { %1026 = vmatprep.mubr.msk.f32.mxu1 %vm362_vm0, %v248_v44  ;;  %v289_v44 = vld [vmem:[%s1232_s13 + $0x380] sm:$0xff] }
  0x74   : > { %574 = vmatmul.mubr.f32.gmra.mxu0 %v217_v41  ;;  %v286_v41 = vld [vmem:[%s1232_s13 + $0x368] sm:$0xff] }
  0x75   : > { %578 = vmatprep.mubr.f32.mxu0 %v222_v42  ;;  %v285_v42 = vld [vmem:[%s1232_s13 + $0x360] sm:$0xff] }
  0x76   : > { %834 = vmatmul.mubr.f32.gmra.mxu1 %v247_v47  ;;  %v298_v47 = vld [vmem:[%s1232_s13 + $0x3c8] sm:$0xff] }
  0x77   : > { %1027 = vmatprep.mubr.msk.f32.mxu1 %vm362_vm0, %v252_v48  ;;  %v297_v48 = vld [vmem:[%s1232_s13 + $0x3c0] sm:$0xff] }
  0x78   : > { %579 = vmatmul.mubr.f32.gmra.mxu0 %v221_v45  ;;  %v294_v45 = vld [vmem:[%s1232_s13 + $0x3a8] sm:$0xff] }
  0x79   : > { %583 = vmatprep.mubr.f32.mxu0 %v226_v46  ;;  %v293_v46 = vld [vmem:[%s1232_s13 + $0x3a0] sm:$0xff] }
  0x7a   : > { %839 = vmatmul.mubr.f32.gmra.mxu1 %v251_v51 }
  0x7b   : > { %1028 = vmatprep.mubr.msk.f32.mxu1 %vm362_vm0, %v256_v52 }
  0x7c   : > { %584 = vmatmul.mubr.f32.gmra.mxu0 %v225_v49  ;;  %v302_v49 = vld [vmem:[%s1232_s13 + $0x3e8] sm:$0xff] }
  0x7d   : > { %588 = vmatprep.mubr.f32.mxu0 %v230_v50  ;;  %v301_v50 = vld [vmem:[%s1232_s13 + $0x3e0] sm:$0xff] }
  0x7e   : > { %844 = vmatmul.mubr.f32.gmra.mxu1 %v255_v55 }
  0x7f   : > { %1029 = vmatprep.mubr.msk.f32.mxu1 %vm362_vm0, %v260_v56 }
  0x80   : > { %589 = vmatmul.mubr.f32.gmra.mxu0 %v229_v53 }
  0x81   : > { %593 = vmatprep.mubr.f32.mxu0 %v234_v54 }
  0x82   : > { %849 = vmatmul.mubr.f32.gmra.mxu1 %v259_v59 }
  0x83   : > { %1030 = vmatprep.mubr.msk.f32.mxu1 %vm362_vm0, %v264_v60 }
  0x84   : > { %594 = vmatmul.mubr.f32.gmra.mxu0 %v233_v57 }
  0x85   : > { %598 = vmatprep.mubr.f32.mxu0 %v238_v58 }
  0x86   : > { %854 = vmatmul.mubr.f32.gmra.mxu1 %v263_v63 }
  0x87   : > { %1031 = vmatprep.mubr.msk.f32.mxu1 %vm362_vm0, %v268_v0 }
  0x88   : > { %599 = vmatmul.mubr.f32.gmra.mxu0 %v237_v61  ;;  %v1463_v61 = vld [vmem:[%s1572_s2] ss:$0 sm:$0xff] }
  0x89   : > { %603 = vmatprep.mubr.f32.mxu0 %v242_v62 }
  0x8a   : > { %859 = vmatmul.mubr.f32.gmra.mxu1 %v267_v4 }
  0x8b   : > { %1032 = vmatprep.mubr.msk.f32.mxu1 %vm362_vm0, %v272_v5 }
  0x8c   : > { %604 = vmatmul.mubr.f32.gmra.mxu0 %v241_v2 }
  0x8d   : > { %608 = vmatprep.mubr.f32.mxu0 %v246_v3 }
  0x8e   : > { %864 = vmatmul.mubr.f32.gmra.mxu1 %v271_v1 }
  0x8f   : > { %1033 = vmatprep.mubr.msk.f32.mxu1 %vm362_vm0, %v276_v8 }
  0x90   : > { %609 = vmatmul.mubr.f32.gmra.mxu0 %v245_v6 }
  0x91   : > { %613 = vmatprep.mubr.f32.mxu0 %v250_v7 }
  0x92   : > { %869 = vmatmul.mubr.f32.gmra.mxu1 %v275_v11 }
  0x93   : > { %1034 = vmatprep.mubr.msk.f32.mxu1 %vm362_vm0, %v280_v12 }
  0x94   : > { %614 = vmatmul.mubr.f32.gmra.mxu0 %v249_v9 }
  0x95   : > { %618 = vmatprep.mubr.f32.mxu0 %v254_v10 }
  0x96   : > { %874 = vmatmul.mubr.f32.gmra.mxu1 %v279_v15 }
  0x97   : > { %1035 = vmatprep.mubr.msk.f32.mxu1 %vm362_vm0, %v284_v16 }
  0x98   : > { %619 = vmatmul.mubr.f32.gmra.mxu0 %v253_v13 }
  0x99   : > { %623 = vmatprep.mubr.f32.mxu0 %v258_v14 }
  0x9a   : > { %879 = vmatmul.mubr.f32.gmra.mxu1 %v283_v19 }
  0x9b   : > { %1036 = vmatprep.mubr.msk.f32.mxu1 %vm362_vm0, %v288_v20 }
  0x9c   : > { %624 = vmatmul.mubr.f32.gmra.mxu0 %v257_v17 }
  0x9d   : > { %628 = vmatprep.mubr.f32.mxu0 %v262_v18 }
  0x9e   : > { %884 = vmatmul.mubr.f32.gmra.mxu1 %v287_v23 }
  0x9f   : > { %1037 = vmatprep.mubr.msk.f32.mxu1 %vm362_vm0, %v292_v24 }
  0xa0   : > { %629 = vmatmul.mubr.f32.gmra.mxu0 %v261_v21 }
  0xa1   : > { %633 = vmatprep.mubr.f32.mxu0 %v266_v22 }
  0xa2   : > { %889 = vmatmul.mubr.f32.gmra.mxu1 %v291_v27 }
  0xa3   : > { %1038 = vmatprep.mubr.msk.f32.mxu1 %vm362_vm0, %v296_v28 }
  0xa4   : > { %634 = vmatmul.mubr.f32.gmra.mxu0 %v265_v25 }
  0xa5   : > { %638 = vmatprep.mubr.f32.mxu0 %v270_v26 }
  0xa6   : > { %894 = vmatmul.mubr.f32.gmra.mxu1 %v295_v31 }
  0xa7   : > { %1039 = vmatprep.mubr.msk.f32.mxu1 %vm362_vm0, %v300_v32 }
  0xa8   : > { %639 = vmatmul.mubr.f32.gmra.mxu0 %v269_v29 }
  0xa9   : > { %643 = vmatprep.mubr.f32.mxu0 %v274_v30 }
  0xaa   : > { %899 = vmatmul.mubr.f32.gmra.mxu1 %v299_v35 }
  0xab   : > { %1040 = vmatprep.mubr.msk.f32.mxu1 %vm362_vm0, %v304_v36 }
  0xac   : > { %644 = vmatmul.mubr.f32.gmra.mxu0 %v273_v33 }
  0xad   : > { %648 = vmatprep.mubr.f32.mxu0 %v278_v34 }
  0xae   : > { %904 = vmatmul.mubr.f32.gmra.mxu1 %v303_v39 }
  0xb0   : > { %649 = vmatmul.mubr.f32.gmra.mxu0 %v277_v37 }
  0xb1   : > { %653 = vmatprep.mubr.f32.mxu0 %v282_v38 }
  0xb4   : > { %654 = vmatmul.mubr.f32.gmra.mxu0 %v281_v40 }
  0xb5   : > { %658 = vmatprep.mubr.f32.mxu0 %v286_v41 }
  0xb8   : > { %659 = vmatmul.mubr.f32.gmra.mxu0 %v285_v42 }
  0xb9   : > { %663 = vmatprep.mubr.f32.mxu0 %v290_v43 }
  0xbc   : > { %664 = vmatmul.mubr.f32.gmra.mxu0 %v289_v44 }
  0xbd   : > { %668 = vmatprep.mubr.f32.mxu0 %v294_v45 }
  0xc0   : > { %669 = vmatmul.mubr.f32.gmra.mxu0 %v293_v46 }
  0xc1   : > { %673 = vmatprep.mubr.f32.mxu0 %v298_v47 }
  0xc4   : > { %674 = vmatmul.mubr.f32.gmra.mxu0 %v297_v48 }
  0xc5   : > { %678 = vmatprep.mubr.f32.mxu0 %v302_v49 }
  0xc8   : > { %679 = vmatmul.mubr.f32.gmra.mxu0 %v301_v50 }
  0xf2   : > { %v750_v51 = vpop.f32.mrf.mxu1 }
  0xf4   : > { %v752_v52 = vpop.f32.mrf.mxu1 }
  0xf6   : > { %v755_v53 = vpop.f32.mrf.mxu1 }
  0xf8   : > { %v757_v54 = vpop.f32.mrf.mxu1 }
  0xfa   : > { %v760_v55 = vpop.f32.mrf.mxu1 }
  0xfc   : > { %v762_v56 = vpop.f32.mrf.mxu1 }
  0xfe   : > { %v765_v57 = vpop.f32.mrf.mxu1 }
 0x100   : > { %v767_v58 = vpop.f32.mrf.mxu1 }
 0x102   : > { %v770_v59 = vpop.f32.mrf.mxu1 }
 0x104   : > { %v772_v60 = vpop.f32.mrf.mxu1 }
 0x106   : > { %v775_v62 = vpop.f32.mrf.mxu1 }
 0x108   : > { %v777_v0 = vpop.f32.mrf.mxu1 }
 0x10a   : > { %v780_v4 = vpop.f32.mrf.mxu1 }
 0x10c   : > { %v525_v63 = vpop.f32.mrf.mxu0  ;;  %v782_v7 = vpop.f32.mrf.mxu1 }
 0x10d   : > { %v526_v2 = vadd.f32 %v1463_v61, %v525_v63 }
 0x10e   : > { %v527_v3 = vpop.f32.mrf.mxu0  ;;  %v785_v9 = vpop.f32.mrf.mxu1 }
 0x10f   : > { %v751_v5 = vadd.f32 %v750_v51, %v526_v2 }
 0x110   : > { %v530_v6 = vpop.f32.mrf.mxu0  ;;  %v787_v12 = vpop.f32.mrf.mxu1 }
 0x111   : > { %910 = vst.msk [vmem:[%s1470_s23] sm:$0xff] %vm909_vm1, %v751_v5  ;;  %v531_v1 = vadd.f32 %v1463_v61, %v530_v6 }
 0x112   : > { %v532_v8 = vpop.f32.mrf.mxu0  ;;  %v790_v15 = vpop.f32.mrf.mxu1 }
 0x113   : > { %v756_v10 = vadd.f32 %v755_v53, %v531_v1 }
 0x114   : > { %v535_v11 = vpop.f32.mrf.mxu0  ;;  %v792_v18 = vpop.f32.mrf.mxu1 }
 0x115   : > { %911 = vst.msk [vmem:[%s1470_s23 + $0x8] sm:$0xff] %vm909_vm1, %v756_v10  ;;  %v536_v13 = vadd.f32 %v1463_v61, %v535_v11 }
 0x116   : > { %v537_v14 = vpop.f32.mrf.mxu0  ;;  %v795_v21 = vpop.f32.mrf.mxu1 }
 0x117   : > { %v761_v16 = vadd.f32 %v760_v55, %v536_v13 }
 0x118   : > { %v540_v17 = vpop.f32.mrf.mxu0  ;;  %v797_v24 = vpop.f32.mrf.mxu1 }
 0x119   : > { %912 = vst.msk [vmem:[%s1470_s23 + $0x10] sm:$0xff] %vm909_vm1, %v761_v16  ;;  %v541_v19 = vadd.f32 %v1463_v61, %v540_v17 }
 0x11a   : > { %v542_v20 = vpop.f32.mrf.mxu0  ;;  %v800_v27 = vpop.f32.mrf.mxu1 }
 0x11b   : > { %v766_v22 = vadd.f32 %v765_v57, %v541_v19 }
 0x11c   : > { %v545_v23 = vpop.f32.mrf.mxu0  ;;  %v802_v30 = vpop.f32.mrf.mxu1 }
 0x11d   : > { %913 = vst.msk [vmem:[%s1470_s23 + $0x18] sm:$0xff] %vm909_vm1, %v766_v22  ;;  %v546_v25 = vadd.f32 %v1463_v61, %v545_v23 }
 0x11e   : > { %v547_v26 = vpop.f32.mrf.mxu0  ;;  %v805_v33 = vpop.f32.mrf.mxu1 }
 0x11f   : > { %v771_v28 = vadd.f32 %v770_v59, %v546_v25 }
 0x120   : > { %v550_v29 = vpop.f32.mrf.mxu0  ;;  %v807_v36 = vpop.f32.mrf.mxu1 }
 0x121   : > { %914 = vst.msk [vmem:[%s1470_s23 + $0x20] sm:$0xff] %vm909_vm1, %v771_v28  ;;  %v551_v31 = vadd.f32 %v1463_v61, %v550_v29 }
 0x122   : > { %v552_v32 = vpop.f32.mrf.mxu0  ;;  %v810_v39 = vpop.f32.mrf.mxu1 }
 0x123   : > { %v776_v34 = vadd.f32 %v775_v62, %v551_v31 }
 0x124   : > { %v555_v35 = vpop.f32.mrf.mxu0  ;;  %v812_v42 = vpop.f32.mrf.mxu1 }
 0x125   : > { %915 = vst.msk [vmem:[%s1470_s23 + $0x28] sm:$0xff] %vm909_vm1, %v776_v34  ;;  %v556_v37 = vadd.f32 %v1463_v61, %v555_v35 }
 0x126   : > { %v557_v38 = vpop.f32.mrf.mxu0  ;;  %v815_v45 = vpop.f32.mrf.mxu1 }
 0x127   : > { %v781_v40 = vadd.f32 %v780_v4, %v556_v37 }
 0x128   : > { %v560_v41 = vpop.f32.mrf.mxu0  ;;  %v817_v48 = vpop.f32.mrf.mxu1 }
 0x129   : > { %916 = vst.msk [vmem:[%s1470_s23 + $0x30] sm:$0xff] %vm909_vm1, %v781_v40  ;;  %v561_v43 = vadd.f32 %v1463_v61, %v560_v41 }
 0x12a   : > { %v562_v44 = vpop.f32.mrf.mxu0  ;;  %v820_v51 = vpop.f32.mrf.mxu1 }
 0x12b   : > { %v786_v46 = vadd.f32 %v785_v9, %v561_v43 }
 0x12c   : > { %v565_v47 = vpop.f32.mrf.mxu0  ;;  %v822_v54 = vpop.f32.mrf.mxu1 }
 0x12d   : > { %917 = vst.msk [vmem:[%s1470_s23 + $0x38] sm:$0xff] %vm909_vm1, %v786_v46  ;;  %v566_v49 = vadd.f32 %v1463_v61, %v565_v47 }
 0x12e   : > { %v567_v50 = vpop.f32.mrf.mxu0  ;;  %v825_v57 = vpop.f32.mrf.mxu1 }
 0x12f   : > { %v791_v52 = vadd.f32 %v790_v15, %v566_v49 }
 0x130   : > { %v570_v53 = vpop.f32.mrf.mxu0  ;;  %v827_v60 = vpop.f32.mrf.mxu1 }
 0x131   : > { %918 = vst.msk [vmem:[%s1470_s23 + $0x40] sm:$0xff] %vm909_vm1, %v791_v52  ;;  %v571_v55 = vadd.f32 %v1463_v61, %v570_v53 }
 0x132   : > { %v572_v56 = vpop.f32.mrf.mxu0  ;;  %v830_v0 = vpop.f32.mrf.mxu1 }
 0x133   : > { %v796_v58 = vadd.f32 %v795_v21, %v571_v55 }
 0x134   : > { %v575_v59 = vpop.f32.mrf.mxu0  ;;  %v832_v4 = vpop.f32.mrf.mxu1 }
 0x135   : > { %919 = vst.msk [vmem:[%s1470_s23 + $0x48] sm:$0xff] %vm909_vm1, %v796_v58  ;;  %v576_v62 = vadd.f32 %v1463_v61, %v575_v59 }
 0x136   : > { %v577_v63 = vpop.f32.mrf.mxu0  ;;  %v835_v7 = vpop.f32.mrf.mxu1 }
 0x137   : > { %v801_v2 = vadd.f32 %v800_v27, %v576_v62 }
 0x138   : > { %v580_v3 = vpop.f32.mrf.mxu0  ;;  %v837_v9 = vpop.f32.mrf.mxu1 }
 0x139   : > { %920 = vst.msk [vmem:[%s1470_s23 + $0x50] sm:$0xff] %vm909_vm1, %v801_v2  ;;  %v581_v5 = vadd.f32 %v1463_v61, %v580_v3 }
 0x13a   : > { %v582_v6 = vpop.f32.mrf.mxu0  ;;  %v840_v12 = vpop.f32.mrf.mxu1 }
 0x13b   : > { %v806_v1 = vadd.f32 %v805_v33, %v581_v5 }
 0x13c   : > { %v585_v8 = vpop.f32.mrf.mxu0  ;;  %v842_v15 = vpop.f32.mrf.mxu1 }
 0x13d   : > { %921 = vst.msk [vmem:[%s1470_s23 + $0x58] sm:$0xff] %vm909_vm1, %v806_v1  ;;  %v586_v10 = vadd.f32 %v1463_v61, %v585_v8 }
 0x13e   : > { %v587_v11 = vpop.f32.mrf.mxu0  ;;  %v845_v18 = vpop.f32.mrf.mxu1 }
 0x13f   : > { %v811_v13 = vadd.f32 %v810_v39, %v586_v10 }
 0x140   : > { %v590_v14 = vpop.f32.mrf.mxu0  ;;  %v847_v21 = vpop.f32.mrf.mxu1 }
 0x141   : > { %922 = vst.msk [vmem:[%s1470_s23 + $0x60] sm:$0xff] %vm909_vm1, %v811_v13  ;;  %v591_v16 = vadd.f32 %v1463_v61, %v590_v14 }
 0x142   : > { %v592_v17 = vpop.f32.mrf.mxu0  ;;  %v850_v24 = vpop.f32.mrf.mxu1 }
 0x143   : > { %v816_v19 = vadd.f32 %v815_v45, %v591_v16 }
 0x144   : > { %v595_v20 = vpop.f32.mrf.mxu0  ;;  %v852_v27 = vpop.f32.mrf.mxu1 }
 0x145   : > { %923 = vst.msk [vmem:[%s1470_s23 + $0x68] sm:$0xff] %vm909_vm1, %v816_v19  ;;  %v596_v22 = vadd.f32 %v1463_v61, %v595_v20 }
 0x146   : > { %v597_v23 = vpop.f32.mrf.mxu0  ;;  %v855_v30 = vpop.f32.mrf.mxu1 }
 0x147   : > { %v821_v25 = vadd.f32 %v820_v51, %v596_v22 }
 0x148   : > { %v600_v26 = vpop.f32.mrf.mxu0  ;;  %v857_v33 = vpop.f32.mrf.mxu1 }
 0x149   : > { %924 = vst.msk [vmem:[%s1470_s23 + $0x70] sm:$0xff] %vm909_vm1, %v821_v25  ;;  %v601_v28 = vadd.f32 %v1463_v61, %v600_v26 }
 0x14a   : > { %v602_v29 = vpop.f32.mrf.mxu0  ;;  %v860_v36 = vpop.f32.mrf.mxu1 }
 0x14b   : > { %v826_v31 = vadd.f32 %v825_v57, %v601_v28 }
 0x14c   : > { %v605_v32 = vpop.f32.mrf.mxu0  ;;  %v862_v39 = vpop.f32.mrf.mxu1 }
 0x14d   : > { %925 = vst.msk [vmem:[%s1470_s23 + $0x78] sm:$0xff] %vm909_vm1, %v826_v31  ;;  %v606_v34 = vadd.f32 %v1463_v61, %v605_v32 }
 0x14e   : > { %v607_v35 = vpop.f32.mrf.mxu0  ;;  %v865_v42 = vpop.f32.mrf.mxu1 }
 0x14f   : > { %v831_v37 = vadd.f32 %v830_v0, %v606_v34 }
 0x150   : > { %v610_v38 = vpop.f32.mrf.mxu0  ;;  %v867_v45 = vpop.f32.mrf.mxu1 }
 0x151   : > { %926 = vst.msk [vmem:[%s1470_s23 + $0x80] sm:$0xff] %vm909_vm1, %v831_v37  ;;  %v611_v40 = vadd.f32 %v1463_v61, %v610_v38 }
 0x152   : > { %v612_v41 = vpop.f32.mrf.mxu0  ;;  %v870_v48 = vpop.f32.mrf.mxu1 }
 0x153   : > { %v836_v43 = vadd.f32 %v835_v7, %v611_v40 }
 0x154   : > { %v615_v44 = vpop.f32.mrf.mxu0  ;;  %v872_v51 = vpop.f32.mrf.mxu1 }
 0x155   : > { %927 = vst.msk [vmem:[%s1470_s23 + $0x88] sm:$0xff] %vm909_vm1, %v836_v43  ;;  %v616_v46 = vadd.f32 %v1463_v61, %v615_v44 }
 0x156   : > { %v617_v47 = vpop.f32.mrf.mxu0  ;;  %v875_v54 = vpop.f32.mrf.mxu1 }
 0x157   : > { %v841_v49 = vadd.f32 %v840_v12, %v616_v46 }
 0x158   : > { %v620_v50 = vpop.f32.mrf.mxu0  ;;  %v877_v57 = vpop.f32.mrf.mxu1 }
 0x159   : > { %928 = vst.msk [vmem:[%s1470_s23 + $0x90] sm:$0xff] %vm909_vm1, %v841_v49  ;;  %v621_v52 = vadd.f32 %v1463_v61, %v620_v50 }
 0x15a   : > { %v622_v53 = vpop.f32.mrf.mxu0  ;;  %v880_v60 = vpop.f32.mrf.mxu1 }
 0x15b   : > { %v846_v55 = vadd.f32 %v845_v18, %v621_v52 }
 0x15c   : > { %v625_v56 = vpop.f32.mrf.mxu0  ;;  %v882_v0 = vpop.f32.mrf.mxu1 }
 0x15d   : > { %929 = vst.msk [vmem:[%s1470_s23 + $0x98] sm:$0xff] %vm909_vm1, %v846_v55  ;;  %v626_v58 = vadd.f32 %v1463_v61, %v625_v56 }
 0x15e   : > { %v627_v59 = vpop.f32.mrf.mxu0  ;;  %v885_v4 = vpop.f32.mrf.mxu1 }
 0x15f   : > { %v851_v62 = vadd.f32 %v850_v24, %v626_v58 }
 0x160   : > { %v630_v63 = vpop.f32.mrf.mxu0  ;;  %v887_v7 = vpop.f32.mrf.mxu1 }
 0x161   : > { %930 = vst.msk [vmem:[%s1470_s23 + $0xa0] sm:$0xff] %vm909_vm1, %v851_v62  ;;  %v631_v2 = vadd.f32 %v1463_v61, %v630_v63 }
 0x162   : > { %v632_v3 = vpop.f32.mrf.mxu0  ;;  %v890_v9 = vpop.f32.mrf.mxu1 }
 0x163   : > { %v856_v5 = vadd.f32 %v855_v30, %v631_v2 }
 0x164   : > { %v635_v6 = vpop.f32.mrf.mxu0  ;;  %v892_v12 = vpop.f32.mrf.mxu1 }
 0x165   : > { %931 = vst.msk [vmem:[%s1470_s23 + $0xa8] sm:$0xff] %vm909_vm1, %v856_v5  ;;  %v636_v1 = vadd.f32 %v1463_v61, %v635_v6 }
 0x166   : > { %v637_v8 = vpop.f32.mrf.mxu0  ;;  %v895_v15 = vpop.f32.mrf.mxu1 }
 0x167   : > { %v861_v10 = vadd.f32 %v860_v36, %v636_v1 }
 0x168   : > { %v640_v11 = vpop.f32.mrf.mxu0  ;;  %v897_v18 = vpop.f32.mrf.mxu1 }
 0x169   : > { %932 = vst.msk [vmem:[%s1470_s23 + $0xb0] sm:$0xff] %vm909_vm1, %v861_v10  ;;  %v641_v13 = vadd.f32 %v1463_v61, %v640_v11 }
 0x16a   : > { %v642_v14 = vpop.f32.mrf.mxu0  ;;  %v900_v21 = vpop.f32.mrf.mxu1 }
 0x16b   : > { %v866_v16 = vadd.f32 %v865_v42, %v641_v13 }
 0x16c   : > { %v645_v17 = vpop.f32.mrf.mxu0  ;;  %v902_v24 = vpop.f32.mrf.mxu1 }
 0x16d   : > { %933 = vst.msk [vmem:[%s1470_s23 + $0xb8] sm:$0xff] %vm909_vm1, %v866_v16  ;;  %v646_v19 = vadd.f32 %v1463_v61, %v645_v17 }
 0x16e   : > { %v647_v20 = vpop.f32.mrf.mxu0  ;;  %v905_v27 = vpop.f32.mrf.mxu1 }
 0x16f   : > { %v871_v22 = vadd.f32 %v870_v48, %v646_v19 }
 0x170   : > { %v650_v23 = vpop.f32.mrf.mxu0  ;;  %v907_v30 = vpop.f32.mrf.mxu1 }
 0x171   : > { %934 = vst.msk [vmem:[%s1470_s23 + $0xc0] sm:$0xff] %vm909_vm1, %v871_v22  ;;  %v651_v25 = vadd.f32 %v1463_v61, %v650_v23 }
 0x172   : > { %v652_v26 = vpop.f32.mrf.mxu0 }
 0x173   : > { %v876_v28 = vadd.f32 %v875_v54, %v651_v25 }
 0x174   : > { %v655_v29 = vpop.f32.mrf.mxu0 }
 0x175   : > { %935 = vst.msk [vmem:[%s1470_s23 + $0xc8] sm:$0xff] %vm909_vm1, %v876_v28  ;;  %v656_v31 = vadd.f32 %v1463_v61, %v655_v29 }
 0x176   : > { %v657_v32 = vpop.f32.mrf.mxu0 }
 0x177   : > { %v881_v33 = vadd.f32 %v880_v60, %v656_v31 }
 0x178   : > { %v660_v34 = vpop.f32.mrf.mxu0 }
 0x179   : > { %936 = vst.msk [vmem:[%s1470_s23 + $0xd0] sm:$0xff] %vm909_vm1, %v881_v33  ;;  %v661_v35 = vadd.f32 %v1463_v61, %v660_v34 }
 0x17a   : > { %v662_v36 = vpop.f32.mrf.mxu0 }
 0x17b   : > { %v886_v37 = vadd.f32 %v885_v4, %v661_v35 }
 0x17c   : > { %v665_v38 = vpop.f32.mrf.mxu0 }
 0x17d   : > { %937 = vst.msk [vmem:[%s1470_s23 + $0xd8] sm:$0xff] %vm909_vm1, %v886_v37  ;;  %v666_v39 = vadd.f32 %v1463_v61, %v665_v38 }
 0x17e   : > { %v667_v40 = vpop.f32.mrf.mxu0 }
 0x17f   : > { %v891_v41 = vadd.f32 %v890_v9, %v666_v39 }
 0x180   : > { %v670_v42 = vpop.f32.mrf.mxu0 }
 0x181   : > { %938 = vst.msk [vmem:[%s1470_s23 + $0xe0] sm:$0xff] %vm909_vm1, %v891_v41  ;;  %v671_v43 = vadd.f32 %v1463_v61, %v670_v42 }
 0x182   : > { %v672_v44 = vpop.f32.mrf.mxu0 }
 0x183   : > { %v896_v45 = vadd.f32 %v895_v15, %v671_v43 }
 0x184   : > { %v675_v46 = vpop.f32.mrf.mxu0 }
 0x185   : > { %939 = vst.msk [vmem:[%s1470_s23 + $0xe8] sm:$0xff] %vm909_vm1, %v896_v45  ;;  %v676_v47 = vadd.f32 %v1463_v61, %v675_v46 }
 0x186   : > { %v677_v48 = vpop.f32.mrf.mxu0 }
 0x187   : > { %v901_v49 = vadd.f32 %v900_v21, %v676_v47 }
 0x188   : > { %v680_v50 = vpop.f32.mrf.mxu0 }
 0x189   : > { %940 = vst.msk [vmem:[%s1470_s23 + $0xf0] sm:$0xff] %vm909_vm1, %v901_v49  ;;  %v681_v51 = vadd.f32 %v1463_v61, %v680_v50 }
 0x18a   : > { %v682_v52 = vpop.f32.mrf.mxu0 }
 0x18b   : > { %v906_v53 = vadd.f32 %v905_v27, %v681_v51 }
 0x18d   : > { %941 = vst.msk [vmem:[%s1470_s23 + $0xf8] sm:$0xff] %vm909_vm1, %v906_v53 }
 0x18e PF: > { %s13_s12 = sadd.s32 1, %s1059_s12  }
 0x18f   : > { %p10_p4 = scmp.ge.s32.totalorder %s13_s12, 4  }
 0x191   :  { %12 = sbr.rel (!%p10_p4) target bundleno = 1 (0x1), region = 62 }

</bundles_post_ra>
